<compile_context>
chip_gen: v5e
topology: v5e:2x2
jax: 0.10.0
libtpu: 0.0.40
codegen_flags: <defaults>
</compile_context>

<pallas_src>
import jax
import jax.numpy as jnp
from jax import lax
from jax.experimental import pallas as pl
from jax.experimental.pallas import tpu as pltpu


P = 4                      # patch size
IMG_C = 3                  # image channels (face crops)
PATCH_DIM = IMG_C * P * P  # 48
D_IN = 256 * 4 * 4         # 4096, fc input dim (CLS feature)
N_CLS = 7                  # fc output dim
N_CLS_PAD = 16             # sublane-padded class dim (7 -> 16), NOT lane-padded to 128
D_LOCAL = 256              # surrogate local-branch feature dim
NSPLIT = 2                 # column split of D_IN/D_LOCAL -> 2 "parallel" grid steps
                           # (one per v7x TensorCore; two pipelined steps on v5e/v6e)


# ----------------------------------------------------------------------------
# Fused Pallas kernel: patch-embed -> tanh -> CLS mean-pool -> fc head
# One grid step = one column half of the feature dims.
# ----------------------------------------------------------------------------
def _fused_head_kernel(p_ref, embw_ref, locw_ref, pool_ref, cls_ref, lcls_ref,
                       fcw_ref, logits_ref, fer_ref, loc_ref):
    """
    p_ref     : (B*Np, 48)          f32   flattened image patches (resident across steps)
    embw_ref  : (48, 2048)          bf16  patch-embed weight half (global branch)
    locw_ref  : (48, 128)           bf16  patch-embed weight half (local branch)
    pool_ref  : (Bp, B*Np)          f32   block-diag 1/Np pooling matrix (resident)
    cls_ref   : (1, 2048)           f32   CLS token half
    lcls_ref  : (1, 128)            f32   local CLS token half
    fcw_ref   : (16, 2048)          bf16  fc weight, transposed + sublane-padded, half
    logits_ref: (1, Bp, 16)         f32   per-step partial logits (summed in XLA)
    fer_ref   : (Bp, 2048)          f32   x_FER column half
    loc_ref   : (Bp, 128)           f32   x_local column half
    """
    # bf16 MXU patch-embed, f32 accumulation.
    patches = p_ref[...].astype(jnp.bfloat16)
    tok = jnp.tanh(jnp.dot(patches, embw_ref[...],
                           preferred_element_type=jnp.float32))       # (B*Np, 2048)
    lok = jnp.tanh(jnp.dot(patches, locw_ref[...],
                           preferred_element_type=jnp.float32))       # (B*Np, 128)

    pool = pool_ref[...]                                              # f32
    x_fer = jnp.dot(pool, tok, preferred_element_type=jnp.float32) + cls_ref[...]
    x_loc = jnp.dot(pool, lok, preferred_element_type=jnp.float32) + lcls_ref[...]

    fer_ref[...] = x_fer
    loc_ref[...] = x_loc

    # fc head on this column half: f32 activations, bf16-stored weight upcast
    # in-kernel; contract the feature dim of both operands (trans_b matmul).
    fcw = fcw_ref[...].astype(jnp.float32)                            # (16, 2048)
    part = lax.dot_general(x_fer, fcw, (((1,), (1,)), ((), ())),
                           preferred_element_type=jnp.float32)        # (Bp, 16)
    logits_ref[...] = part[None]


# ----------------------------------------------------------------------------
# Plain-JAX glue (layout only)
# ----------------------------------------------------------------------------
def extract_patches(x_img):
    """NCHW image -> (B, Np, C*P*P) non-overlapping P x P patches."""
    B, C, H, W = x_img.shape
    p = x_img.reshape(B, C, H // P, P, W // P, P)
    p = p.transpose(0, 2, 4, 1, 3, 5).reshape(B, (H // P) * (W // P), C * P * P)
    return p


def make_pool(B, Np):
    """Precomputed (outside jit) block-diagonal 1/Np pooling matrix, batch padded to 8."""
    Bp = ((B + 7) // 8) * 8
    row = jax.lax.broadcasted_iota(jnp.int32, (Bp, B * Np), 0)
    col = jax.lax.broadcasted_iota(jnp.int32, (Bp, B * Np), 1)
    return jnp.where(col // Np == row, jnp.float32(1.0 / Np), jnp.float32(0.0))


@jax.jit
def generate_model_forward(params, x_img, pool):
    """Returns (logits, x_FER, x_local), matching the reference module's tuple."""
    B = x_img.shape[0]
    patches = extract_patches(x_img)                   # (B, Np, 48)
    Np = patches.shape[1]
    p2d = patches.reshape(B * Np, PATCH_DIM)
    Bp = pool.shape[0]

    d_half = D_IN // NSPLIT
    l_half = D_LOCAL // NSPLIT

    logits_part, x_fer_pad, x_loc_pad = pl.pallas_call(
        _fused_head_kernel,
        out_shape=(
            jax.ShapeDtypeStruct((NSPLIT, Bp, N_CLS_PAD), jnp.float32),
            jax.ShapeDtypeStruct((Bp, D_IN), jnp.float32),
            jax.ShapeDtypeStruct((Bp, D_LOCAL), jnp.float32),
        ),
        grid=(NSPLIT,),
        in_specs=[
            pl.BlockSpec((B * Np, PATCH_DIM), lambda j: (0, 0)),   # patches (resident)
            pl.BlockSpec((PATCH_DIM, d_half), lambda j: (0, j)),   # emb_w half (bf16)
            pl.BlockSpec((PATCH_DIM, l_half), lambda j: (0, j)),   # loc_w half (bf16)
            pl.BlockSpec((Bp, B * Np), lambda j: (0, 0)),          # pool (resident)
            pl.BlockSpec((1, d_half), lambda j: (0, j)),           # cls token half
            pl.BlockSpec((1, l_half), lambda j: (0, j)),           # local cls half
            pl.BlockSpec((N_CLS_PAD, d_half), lambda j: (0, j)),   # fc weight half (bf16)
        ],
        out_specs=(
            pl.BlockSpec((1, Bp, N_CLS_PAD), lambda j: (j, 0, 0)),
            pl.BlockSpec((Bp, d_half), lambda j: (0, j)),
            pl.BlockSpec((Bp, l_half), lambda j: (0, j)),
        ),
        compiler_params=pltpu.CompilerParams(
            dimension_semantics=("parallel",),                     # v7x: one step per TC
        ),
    )(p2d, params["emb_w"], params["loc_w"], pool,
      params["cls_tok"], params["loc_cls"], params["fcw_t"])

    # Sum the two per-core partial logits, drop padding, add bias (tiny XLA ops).
    logits = logits_part.sum(axis=0)[:B, :N_CLS] + params["fc_b"]
    return logits, x_fer_pad[:B], x_loc_pad[:B]


# ----------------------------------------------------------------------------
# Deterministic parameter init (synthetic, no checkpoint) -- kernel-ready layout
# ----------------------------------------------------------------------------
def init_params(key):
    ks = jax.random.split(key, 6)
    s = 0.02
    # fc = nn.Linear(256*4*4, 7): store transposed, bf16, sublane-padded 7 -> 16.
    fc_w = jax.random.normal(ks[0], (D_IN, N_CLS), jnp.float32) * s
    fcw_t = (jnp.zeros((N_CLS_PAD, D_IN), jnp.bfloat16)
             .at[:N_CLS, :].set(fc_w.T.astype(jnp.bfloat16)))
    return {
        "fcw_t": fcw_t,
        "fc_b": jax.random.normal(ks[1], (N_CLS,), jnp.float32) * s,
        # surrogate s_former params (bf16 MXU weights, f32 residual tokens)
        "emb_w": (jax.random.normal(ks[2], (PATCH_DIM, D_IN), jnp.float32) * s
                  ).astype(jnp.bfloat16),
        "cls_tok": jax.random.normal(ks[3], (1, D_IN), jnp.float32) * s,
        "loc_w": (jax.random.normal(ks[4], (PATCH_DIM, D_LOCAL), jnp.float32) * s
                  ).astype(jnp.bfloat16),
        "loc_cls": jax.random.normal(ks[5], (1, D_LOCAL), jnp.float32) * s,
    }


if __name__ == "__main__":
    key = jax.random.PRNGKey(0)
    k_param, k_input = jax.random.split(key)
    params = init_params(k_param)

    # small deterministic input image, NCHW
    B, H, W = 2, 16, 16
    x_img = jax.random.normal(k_input, (B, IMG_C, H, W), jnp.float32)
    Np = (H // P) * (W // P)
    pool = make_pool(B, Np)                       # precomputed outside jit

    logits, x_FER, x_local = generate_model_forward(params, x_img, pool)
    jax.block_until_ready((logits, x_FER, x_local))

    # plain-JAX reference of the same (surrogate) forward, bf16-rounded weights
    patches = extract_patches(x_img)              # (B, Np, 48)
    hi = jax.lax.Precision.HIGHEST
    p_bf = patches.astype(jnp.bfloat16).astype(jnp.float32)
    emb_f = params["emb_w"].astype(jnp.float32)
    loc_f = params["loc_w"].astype(jnp.float32)
    tok_ref = jnp.tanh(jnp.einsum("bpd,de->bpe", p_bf, emb_f, precision=hi))
    lok_ref = jnp.tanh(jnp.einsum("bpd,de->bpe", p_bf, loc_f, precision=hi))
    x_fer_ref = tok_ref.mean(axis=1) + params["cls_tok"]      # (B, 4096)
    x_loc_ref = lok_ref.mean(axis=1) + params["loc_cls"]      # (B, 256)
    fcw_f = params["fcw_t"][:N_CLS].astype(jnp.float32)       # (7, 4096)
    logits_ref = jnp.einsum("bd,cd->bc", x_fer_ref, fcw_f, precision=hi) + params["fc_b"]

    assert logits.shape == (B, N_CLS)
    assert x_FER.shape == (B, D_IN)
    assert x_local.shape == (B, D_LOCAL)
    assert jnp.allclose(x_FER, x_fer_ref, atol=2e-3, rtol=2e-2)
    assert jnp.allclose(x_local, x_loc_ref, atol=2e-3, rtol=2e-2)
    assert jnp.allclose(logits, logits_ref, atol=1e-2, rtol=2e-2)

    print("KERNEL_OK")
</pallas_src>

<mosaic_0001>
module attributes {stable_mosaic.version = 11 : i64} {
  func.func @_fused_head_kernel(%arg0: i32, %arg1: memref<32x48xf32, #tpu.memory_space<vmem>>, %arg2: memref<48x2048xbf16, #tpu.memory_space<vmem>>, %arg3: memref<48x128xbf16, #tpu.memory_space<vmem>>, %arg4: memref<8x32xf32, #tpu.memory_space<vmem>>, %arg5: memref<1x2048xf32, #tpu.memory_space<vmem>>, %arg6: memref<1x128xf32, #tpu.memory_space<vmem>>, %arg7: memref<16x2048xbf16, #tpu.memory_space<vmem>>, %arg8: memref<1x8x16xf32, #tpu.memory_space<vmem>>, %arg9: memref<8x2048xf32, #tpu.memory_space<vmem>>, %arg10: memref<8x128xf32, #tpu.memory_space<vmem>>) attributes {dimension_semantics = [#tpu.dimension_semantics<parallel>], iteration_bounds = array<i64: 2>, scalar_prefetch = 0 : i64, scratch_operands = 0 : i64, tpu.core_type = #tpu.core_type<tc>, window_params = [{pipeline_mode = #tpu.pipeline_mode<synchronous>, transform_indices = @transform_0, window_bounds = array<i64: 32, 48>}, {transform_indices = @transform_1, window_bounds = array<i64: 48, 2048>}, {transform_indices = @transform_2, window_bounds = array<i64: 48, 128>}, {pipeline_mode = #tpu.pipeline_mode<synchronous>, transform_indices = @transform_3, window_bounds = array<i64: 8, 32>}, {transform_indices = @transform_4, window_bounds = array<i64: 1, 2048>}, {transform_indices = @transform_5, window_bounds = array<i64: 1, 128>}, {transform_indices = @transform_6, window_bounds = array<i64: 16, 2048>}, {transform_indices = @transform_7, window_bounds = array<i64: 1, 8, 16>}, {transform_indices = @transform_8, window_bounds = array<i64: 8, 2048>}, {transform_indices = @transform_9, window_bounds = array<i64: 8, 128>}]} {
    %c0 = arith.constant 0 : index
    %c0_0 = arith.constant 0 : index
    %0 = vector.load %arg1[%c0, %c0_0] : memref<32x48xf32, #tpu.memory_space<vmem>>, vector<32x48xf32>
    %1 = arith.truncf %0 : vector<32x48xf32> to vector<32x48xbf16>
    %c0_1 = arith.constant 0 : index
    %c0_2 = arith.constant 0 : index
    %2 = vector.load %arg2[%c0_1, %c0_2] : memref<48x2048xbf16, #tpu.memory_space<vmem>>, vector<48x2048xbf16>
    %cst = arith.constant dense<0.000000e+00> : vector<32x2048xf32>
    %3 = tpu.matmul %1, %2, %cst {dimension_numbers = #tpu.dot_dimension_numbers<[1], [0], [0], [1], [0, 0, 1, 1], [], []>} : vector<32x48xbf16>, vector<48x2048xbf16>, vector<32x2048xf32> -> vector<32x2048xf32>
    %4 = math.tanh %3 : vector<32x2048xf32>
    %c0_3 = arith.constant 0 : index
    %c0_4 = arith.constant 0 : index
    %5 = vector.load %arg3[%c0_3, %c0_4] : memref<48x128xbf16, #tpu.memory_space<vmem>>, vector<48x128xbf16>
    %cst_5 = arith.constant dense<0.000000e+00> : vector<32x128xf32>
    %6 = tpu.matmul %1, %5, %cst_5 {dimension_numbers = #tpu.dot_dimension_numbers<[1], [0], [0], [1], [0, 0, 1, 1], [], []>} : vector<32x48xbf16>, vector<48x128xbf16>, vector<32x128xf32> -> vector<32x128xf32>
    %7 = math.tanh %6 : vector<32x128xf32>
    %c0_6 = arith.constant 0 : index
    %c0_7 = arith.constant 0 : index
    %8 = vector.load %arg4[%c0_6, %c0_7] : memref<8x32xf32, #tpu.memory_space<vmem>>, vector<8x32xf32>
    %cst_8 = arith.constant dense<0.000000e+00> : vector<8x2048xf32>
    %9 = tpu.matmul %8, %4, %cst_8 {dimension_numbers = #tpu.dot_dimension_numbers<[1], [0], [0], [1], [0, 0, 1, 1], [], []>} : vector<8x32xf32>, vector<32x2048xf32>, vector<8x2048xf32> -> vector<8x2048xf32>
    %c0_9 = arith.constant 0 : index
    %c0_10 = arith.constant 0 : index
    %10 = vector.load %arg5[%c0_9, %c0_10] : memref<1x2048xf32, #tpu.memory_space<vmem>>, vector<1x2048xf32>
    %11 = vector.broadcast %10 : vector<1x2048xf32> to vector<8x2048xf32>
    %12 = arith.addf %9, %11 : vector<8x2048xf32>
    %cst_11 = arith.constant dense<0.000000e+00> : vector<8x128xf32>
    %13 = tpu.matmul %8, %7, %cst_11 {dimension_numbers = #tpu.dot_dimension_numbers<[1], [0], [0], [1], [0, 0, 1, 1], [], []>} : vector<8x32xf32>, vector<32x128xf32>, vector<8x128xf32> -> vector<8x128xf32>
    %c0_12 = arith.constant 0 : index
    %c0_13 = arith.constant 0 : index
    %14 = vector.load %arg6[%c0_12, %c0_13] : memref<1x128xf32, #tpu.memory_space<vmem>>, vector<1x128xf32>
    %15 = vector.broadcast %14 : vector<1x128xf32> to vector<8x128xf32>
    %16 = arith.addf %13, %15 : vector<8x128xf32>
    %c0_14 = arith.constant 0 : index
    %c0_15 = arith.constant 0 : index
    %17 = vector.load %arg9[%c0_14, %c0_15] : memref<8x2048xf32, #tpu.memory_space<vmem>>, vector<8x2048xf32>
    tpu.vector_store %arg9[%c0_14, %c0_15], %12 {strides = array<i32>} : memref<8x2048xf32, #tpu.memory_space<vmem>>, vector<8x2048xf32>,
    %c0_16 = arith.constant 0 : index
    %c0_17 = arith.constant 0 : index
    %18 = vector.load %arg10[%c0_16, %c0_17] : memref<8x128xf32, #tpu.memory_space<vmem>>, vector<8x128xf32>
    tpu.vector_store %arg10[%c0_16, %c0_17], %16 {strides = array<i32>} : memref<8x128xf32, #tpu.memory_space<vmem>>, vector<8x128xf32>,
    %c0_18 = arith.constant 0 : index
    %c0_19 = arith.constant 0 : index
    %19 = vector.load %arg7[%c0_18, %c0_19] : memref<16x2048xbf16, #tpu.memory_space<vmem>>, vector<16x2048xbf16>
    %20 = arith.extf %19 : vector<16x2048xbf16> to vector<16x2048xf32>
    %cst_20 = arith.constant dense<0.000000e+00> : vector<8x16xf32>
    %21 = tpu.matmul %12, %20, %cst_20 {dimension_numbers = #tpu.dot_dimension_numbers<[1], [1], [0], [0], [0, 0, 1, 0], [], []>} : vector<8x2048xf32>, vector<16x2048xf32>, vector<8x16xf32> -> vector<8x16xf32>
    %22 = vector.shape_cast %21 : vector<8x16xf32> to vector<1x8x16xf32>
    %c0_21 = arith.constant 0 : index
    %c0_22 = arith.constant 0 : index
    %c0_23 = arith.constant 0 : index
    %23 = vector.load %arg8[%c0_21, %c0_22, %c0_23] : memref<1x8x16xf32, #tpu.memory_space<vmem>>, vector<1x8x16xf32>
    tpu.vector_store %arg8[%c0_21, %c0_22, %c0_23], %22 {strides = array<i32>} : memref<1x8x16xf32, #tpu.memory_space<vmem>>, vector<1x8x16xf32>,
    return
  }
  func.func @transform_0(%arg0: i32) -> (i32, i32) {
    %c0_i32 = arith.constant 0 : i32
    %c0_i32_0 = arith.constant 0 : i32
    %c0_i32_1 = arith.constant 0 : i32
    return %c0_i32, %c0_i32_0 : i32, i32
  }
  func.func @transform_1(%arg0: i32) -> (i32, i32) {
    %c0_i32 = arith.constant 0 : i32
    %c0_i32_0 = arith.constant 0 : i32
    return %c0_i32, %arg0 : i32, i32
  }
  func.func @transform_2(%arg0: i32) -> (i32, i32) {
    %c0_i32 = arith.constant 0 : i32
    %c0_i32_0 = arith.constant 0 : i32
    return %c0_i32, %arg0 : i32, i32
  }
  func.func @transform_3(%arg0: i32) -> (i32, i32) {
    %c0_i32 = arith.constant 0 : i32
    %c0_i32_0 = arith.constant 0 : i32
    %c0_i32_1 = arith.constant 0 : i32
    return %c0_i32, %c0_i32_0 : i32, i32
  }
  func.func @transform_4(%arg0: i32) -> (i32, i32) {
    %c0_i32 = arith.constant 0 : i32
    %c0_i32_0 = arith.constant 0 : i32
    return %c0_i32, %arg0 : i32, i32
  }
  func.func @transform_5(%arg0: i32) -> (i32, i32) {
    %c0_i32 = arith.constant 0 : i32
    %c0_i32_0 = arith.constant 0 : i32
    return %c0_i32, %arg0 : i32, i32
  }
  func.func @transform_6(%arg0: i32) -> (i32, i32) {
    %c0_i32 = arith.constant 0 : i32
    %c0_i32_0 = arith.constant 0 : i32
    return %c0_i32, %arg0 : i32, i32
  }
  func.func @transform_7(%arg0: i32) -> (i32, i32, i32) {
    %c0_i32 = arith.constant 0 : i32
    %c0_i32_0 = arith.constant 0 : i32
    %c0_i32_1 = arith.constant 0 : i32
    return %arg0, %c0_i32, %c0_i32_0 : i32, i32, i32
  }
  func.func @transform_8(%arg0: i32) -> (i32, i32) {
    %c0_i32 = arith.constant 0 : i32
    %c0_i32_0 = arith.constant 0 : i32
    return %c0_i32, %arg0 : i32, i32
  }
  func.func @transform_9(%arg0: i32) -> (i32, i32) {
    %c0_i32 = arith.constant 0 : i32
    %c0_i32_0 = arith.constant 0 : i32
    return %c0_i32, %arg0 : i32, i32
  }
}

</mosaic_0001>

<bundles_post_ra>
// kernel: generate_model_forward.1
= control target key start
LH: loop header
LB: loop body
LE: loop exit
PB: predicated region body
PF: predicated region fallthrough
CT: control target
= control target key end

     0   :  { %s2890_s30 = smov 0   ;;  %s2892_s10 = smov 0   ;;  %s3397_s0 = inlined_call_operand.vmem [shape: f32[32,48], index: 0, kind: input, shape index: {}]   ;;  %s3398_s1 = inlined_call_operand.vmem [shape: bf16[48,4096], index: 1, kind: input, shape index: {}]   ;;  %s3399_s2 = inlined_call_operand.vmem [shape: bf16[48,256], index: 2, kind: input, shape index: {}]   ;;  %s3400_s3 = inlined_call_operand.vmem [shape: f32[8,32], index: 3, kind: input, shape index: {}]   ;;  %s3401_s4 = inlined_call_operand.vmem [shape: f32[1,4096], index: 4, kind: input, shape index: {}]   ;;  %s3402_s5 = inlined_call_operand.vmem [shape: f32[1,256], index: 5, kind: input, shape index: {}]   ;;  %s3403_s6 = inlined_call_operand.vmem [shape: bf16[16,4096], index: 6, kind: input, shape index: {}]   ;;  %s3404_s7 = inlined_call_operand.vmem [shape: f32[2,8,16], index: 7, kind: output, shape index: {0}]   ;;  %s3405_s8 = inlined_call_operand.vmem [shape: f32[8,4096], index: 8, kind: output, shape index: {1}]   ;;  %s3406_s9 = inlined_call_operand.vmem [shape: f32[8,256], index: 9, kind: output, shape index: {2}]  }
   0x1   :  { %s2894_s11 = smov 0  }
   0x2 LB: > { %s2906_s12 = sadd.s32 4294967295, %s2838_s11   ;;  %s2909_s13 = sadd.s32 1, %s2838_s11   ;;  %s2838_s11 = sphi %s2894_s11, %s3410_s11   ;;  %s2834_s10 = sphi %s2892_s10, %s3409_s10   ;;  %s2830_s30 = sphi %s2890_s30, %s3408_s30  }
   0x3   : > { %s45_s14 = ssub.s32 %s2838_s11, %s2909_s13  ;;  %s48_s15 = sadd.s32 1, %s2834_s10 }
   0x4   : > { %p46_p0 = scmp.eq.s32.totalorder %s45_s14, 0  ;;  %p55_p1 = scmp.ne.s32.totalorder %s2834_s10, %s2830_s30 }
   0x5   : > { %p56_p2 = scmp.eq.s32.totalorder %s2838_s11, 0  ;;  %p2327_p4 = scmp.ge.s32.totalorder %s2838_s11, 2 }
   0x6   : > { %s2918_s16 = scalar_select %p46_p0, %s2834_s10, %s48_s15  }
   0x7   : > { %p2920_p3 = por %p56_p2, %p55_p1  ;;  %290 = sbr.rel (%p2327_p4) target bundleno = 95 (0x5f), region = 24 }
   0xc   : > { %293 = sbr.rel (!%p2920_p3) target bundleno = 64 (0x40), region = 28  ;;  %s295_s18 = sand.u32 (%p2920_p3), 1, %s2834_s10  }
   0xd   : > { %s2598_s19 = sshll.u32 (%p2920_p3), %s2838_s11, 6  ;;  %s2651_s20 = smul.u32 (%p2920_p3), 384, %s295_s18 }
   0xe   : > { %s2932_s23 = scalar_lea.vmem (%p2920_p3), %s3398_s1, %s2598_s19 }
   0xf   : > { %v313_v0 = vld [vmem:[%s2932_s23] sm:$0xff] (%p2920_p3)  ;;  %v315_v1 = vld [vmem:[%s2932_s23 + $0x8] sm:$0xff] (%p2920_p3)  ;;  %v317_v2 = vld [vmem:[%s2932_s23 + $0x10] sm:$0xff] (%p2920_p3)  ;;  %s2937_s24 = scalar_lea.vmem (%p2920_p3), [#allocation2], %s2651_s20 }
  0x10   : > { %314 = vst [vmem:[%s2937_s24] sm:$0xff] (%p2920_p3), %v313_v0  ;;  %v319_v3 = vld [vmem:[%s2932_s23 + $0x18] sm:$0xff] (%p2920_p3)  ;;  %v321_v4 = vld [vmem:[%s2932_s23 + $0x20] sm:$0xff] (%p2920_p3)  ;;  %v323_v5 = vld [vmem:[%s2932_s23 + $0x28] sm:$0xff] (%p2920_p3) }
  0x11   : > { %316 = vst [vmem:[%s2937_s24 + $0x8] sm:$0xff] %v315_v1  ;;  %v325_v6 = vld [vmem:[%s2932_s23 + $0x30] sm:$0xff]  ;;  %v327_v7 = vld [vmem:[%s2932_s23 + $0x38] sm:$0xff]  ;;  %v329_v8 = vld [vmem:[%s2932_s23 + $0x80] sm:$0xff] }
  0x12   : > { %318 = vst [vmem:[%s2937_s24 + $0x10] sm:$0xff] %v317_v2  ;;  %v331_v9 = vld [vmem:[%s2932_s23 + $0x88] sm:$0xff]  ;;  %v333_v10 = vld [vmem:[%s2932_s23 + $0x90] sm:$0xff]  ;;  %v335_v11 = vld [vmem:[%s2932_s23 + $0x98] sm:$0xff] }
  0x13   : > { %320 = vst [vmem:[%s2937_s24 + $0x18] sm:$0xff] %v319_v3  ;;  %v337_v12 = vld [vmem:[%s2932_s23 + $0xa0] sm:$0xff]  ;;  %v339_v13 = vld [vmem:[%s2932_s23 + $0xa8] sm:$0xff]  ;;  %v341_v14 = vld [vmem:[%s2932_s23 + $0xb0] sm:$0xff] }
  0x14   : > { %322 = vst [vmem:[%s2937_s24 + $0x20] sm:$0xff] %v321_v4  ;;  %v343_v15 = vld [vmem:[%s2932_s23 + $0xb8] sm:$0xff]  ;;  %v345_v16 = vld [vmem:[%s2932_s23 + $0x100] sm:$0xff]  ;;  %v347_v17 = vld [vmem:[%s2932_s23 + $0x108] sm:$0xff] }
  0x15   : > { %324 = vst [vmem:[%s2937_s24 + $0x28] sm:$0xff] %v323_v5  ;;  %v349_v18 = vld [vmem:[%s2932_s23 + $0x110] sm:$0xff]  ;;  %v351_v19 = vld [vmem:[%s2932_s23 + $0x118] sm:$0xff]  ;;  %v353_v20 = vld [vmem:[%s2932_s23 + $0x120] sm:$0xff] }
  0x16   : > { %326 = vst [vmem:[%s2937_s24 + $0x30] sm:$0xff] %v325_v6  ;;  %v355_v21 = vld [vmem:[%s2932_s23 + $0x128] sm:$0xff]  ;;  %v357_v22 = vld [vmem:[%s2932_s23 + $0x130] sm:$0xff]  ;;  %v359_v23 = vld [vmem:[%s2932_s23 + $0x138] sm:$0xff] }
  0x17   : > { %328 = vst [vmem:[%s2937_s24 + $0x38] sm:$0xff] %v327_v7  ;;  %v361_v24 = vld [vmem:[%s2932_s23 + $0x180] sm:$0xff]  ;;  %v363_v25 = vld [vmem:[%s2932_s23 + $0x188] sm:$0xff]  ;;  %v365_v26 = vld [vmem:[%s2932_s23 + $0x190] sm:$0xff] }
  0x18   : > { %330 = vst [vmem:[%s2937_s24 + $0x40] sm:$0xff] %v329_v8  ;;  %v367_v27 = vld [vmem:[%s2932_s23 + $0x198] sm:$0xff]  ;;  %v369_v28 = vld [vmem:[%s2932_s23 + $0x1a0] sm:$0xff]  ;;  %v371_v29 = vld [vmem:[%s2932_s23 + $0x1a8] sm:$0xff] }
  0x19   : > { %332 = vst [vmem:[%s2937_s24 + $0x48] sm:$0xff] %v331_v9  ;;  %v373_v30 = vld [vmem:[%s2932_s23 + $0x1b0] sm:$0xff]  ;;  %v375_v31 = vld [vmem:[%s2932_s23 + $0x1b8] sm:$0xff]  ;;  %v377_v32 = vld [vmem:[%s2932_s23 + $0x200] sm:$0xff] }
  0x1a   : > { %334 = vst [vmem:[%s2937_s24 + $0x50] sm:$0xff] %v333_v10  ;;  %v379_v33 = vld [vmem:[%s2932_s23 + $0x208] sm:$0xff]  ;;  %v381_v34 = vld [vmem:[%s2932_s23 + $0x210] sm:$0xff]  ;;  %v383_v35 = vld [vmem:[%s2932_s23 + $0x218] sm:$0xff] }
  0x1b   : > { %336 = vst [vmem:[%s2937_s24 + $0x58] sm:$0xff] %v335_v11  ;;  %v385_v36 = vld [vmem:[%s2932_s23 + $0x220] sm:$0xff]  ;;  %v387_v37 = vld [vmem:[%s2932_s23 + $0x228] sm:$0xff]  ;;  %v389_v38 = vld [vmem:[%s2932_s23 + $0x230] sm:$0xff] }
  0x1c   : > { %338 = vst [vmem:[%s2937_s24 + $0x60] sm:$0xff] %v337_v12  ;;  %v391_v39 = vld [vmem:[%s2932_s23 + $0x238] sm:$0xff]  ;;  %v393_v40 = vld [vmem:[%s2932_s23 + $0x280] sm:$0xff]  ;;  %v395_v41 = vld [vmem:[%s2932_s23 + $0x288] sm:$0xff] }
  0x1d   : > { %340 = vst [vmem:[%s2937_s24 + $0x68] sm:$0xff] %v339_v13  ;;  %v397_v42 = vld [vmem:[%s2932_s23 + $0x290] sm:$0xff]  ;;  %v399_v43 = vld [vmem:[%s2932_s23 + $0x298] sm:$0xff]  ;;  %v401_v44 = vld [vmem:[%s2932_s23 + $0x2a0] sm:$0xff] }
  0x1e   : > { %342 = vst [vmem:[%s2937_s24 + $0x70] sm:$0xff] %v341_v14  ;;  %v403_v45 = vld [vmem:[%s2932_s23 + $0x2a8] sm:$0xff]  ;;  %v405_v46 = vld [vmem:[%s2932_s23 + $0x2b0] sm:$0xff]  ;;  %v407_v47 = vld [vmem:[%s2932_s23 + $0x2b8] sm:$0xff] }
  0x1f   : > { %344 = vst [vmem:[%s2937_s24 + $0x78] sm:$0xff] %v343_v15 }
  0x20   : > { %346 = vst [vmem:[%s2937_s24 + $0x80] sm:$0xff] %v345_v16 }
  0x21   : > { %348 = vst [vmem:[%s2937_s24 + $0x88] sm:$0xff] %v347_v17 }
  0x22   : > { %350 = vst [vmem:[%s2937_s24 + $0x90] sm:$0xff] %v349_v18 }
  0x23   : > { %352 = vst [vmem:[%s2937_s24 + $0x98] sm:$0xff] %v351_v19 }
  0x24   : > { %354 = vst [vmem:[%s2937_s24 + $0xa0] sm:$0xff] %v353_v20 }
  0x25   : > { %356 = vst [vmem:[%s2937_s24 + $0xa8] sm:$0xff] %v355_v21 }
  0x26   : > { %358 = vst [vmem:[%s2937_s24 + $0xb0] sm:$0xff] %v357_v22 }
  0x27   : > { %360 = vst [vmem:[%s2937_s24 + $0xb8] sm:$0xff] %v359_v23 }
  0x28   : > { %362 = vst [vmem:[%s2937_s24 + $0xc0] sm:$0xff] %v361_v24 }
  0x29   : > { %364 = vst [vmem:[%s2937_s24 + $0xc8] sm:$0xff] %v363_v25 }
  0x2a   : > { %366 = vst [vmem:[%s2937_s24 + $0xd0] sm:$0xff] %v365_v26 }
  0x2b   : > { %368 = vst [vmem:[%s2937_s24 + $0xd8] sm:$0xff] %v367_v27 }
  0x2c   : > { %370 = vst [vmem:[%s2937_s24 + $0xe0] sm:$0xff] %v369_v28 }
  0x2d   : > { %372 = vst [vmem:[%s2937_s24 + $0xe8] sm:$0xff] %v371_v29 }
  0x2e   : > { %374 = vst [vmem:[%s2937_s24 + $0xf0] sm:$0xff] %v373_v30 }
  0x2f   : > { %376 = vst [vmem:[%s2937_s24 + $0xf8] sm:$0xff] %v375_v31 }
  0x30   : > { %378 = vst [vmem:[%s2937_s24 + $0x100] sm:$0xff] %v377_v32 }
  0x31   : > { %380 = vst [vmem:[%s2937_s24 + $0x108] sm:$0xff] %v379_v33 }
  0x32   : > { %382 = vst [vmem:[%s2937_s24 + $0x110] sm:$0xff] %v381_v34 }
  0x33   : > { %384 = vst [vmem:[%s2937_s24 + $0x118] sm:$0xff] %v383_v35 }
  0x34   : > { %386 = vst [vmem:[%s2937_s24 + $0x120] sm:$0xff] %v385_v36 }
  0x35   : > { %388 = vst [vmem:[%s2937_s24 + $0x128] sm:$0xff] %v387_v37 }
  0x36   : > { %390 = vst [vmem:[%s2937_s24 + $0x130] sm:$0xff] %v389_v38 }
  0x37   : > { %392 = vst [vmem:[%s2937_s24 + $0x138] sm:$0xff] %v391_v39 }
  0x38   : > { %394 = vst [vmem:[%s2937_s24 + $0x140] sm:$0xff] %v393_v40 }
  0x39   : > { %396 = vst [vmem:[%s2937_s24 + $0x148] sm:$0xff] %v395_v41 }
  0x3a   : > { %398 = vst [vmem:[%s2937_s24 + $0x150] sm:$0xff] %v397_v42 }
  0x3b   : > { %400 = vst [vmem:[%s2937_s24 + $0x158] sm:$0xff] %v399_v43 }
  0x3c   : > { %402 = vst [vmem:[%s2937_s24 + $0x160] sm:$0xff] %v401_v44 }
  0x3d   : > { %404 = vst [vmem:[%s2937_s24 + $0x168] sm:$0xff] %v403_v45 }
  0x3e   : > { %406 = vst [vmem:[%s2937_s24 + $0x170] sm:$0xff] %v405_v46 }
  0x3f   : > { %408 = vst [vmem:[%s2937_s24 + $0x178] sm:$0xff] %v407_v47 }
  0x40 PF: > { %414 = sbr.rel (!%p2920_p3) target bundleno = 75 (0x4b), region = 51  ;;  %s416_s25 = sand.u32 (%p2920_p3), 1, %s2834_s10  }
  0x41   : > { %s2330_s26 = sshll.u32 (%p2920_p3), %s2838_s11, 2  ;;  %s2652_s27 = smul.u32 (%p2920_p3), 24, %s416_s25 }
  0x42   : > { %s420_s14 = scalar_lea.vmem (%p2920_p3), %s3399_s2, %s2330_s26 }
  0x43   : > { %v437_v48 = vld [vmem:[%s420_s14] sm:$0xf] (%p2920_p3)  ;;  %v439_v49 = vld [vmem:[%s420_s14 + $0x8] sm:$0xf] (%p2920_p3)  ;;  %v441_v50 = vld [vmem:[%s420_s14 + $0x10] sm:$0xf] (%p2920_p3) }
  0x44   : > { %s418_s15 = scalar_lea.vmem (%p2920_p3), [#allocation3], %s2652_s27  ;;  %v443_v51 = vld [vmem:[%s420_s14 + $0x18] sm:$0xf] (%p2920_p3)  ;;  %v445_v52 = vld [vmem:[%s420_s14 + $0x20] sm:$0xf] (%p2920_p3) }
  0x45   : > { %438 = vst [vmem:[%s418_s15] sm:$0xf] %v437_v48  ;;  %v447_v53 = vld [vmem:[%s420_s14 + $0x28] sm:$0xf] }
  0x46   : > { %440 = vst [vmem:[%s418_s15 + $0x4] sm:$0xf] %v439_v49 }
  0x47   : > { %442 = vst [vmem:[%s418_s15 + $0x8] sm:$0xf] %v441_v50 }
  0x48   : > { %444 = vst [vmem:[%s418_s15 + $0xc] sm:$0xf] %v443_v51 }
  0x49   : > { %446 = vst [vmem:[%s418_s15 + $0x10] sm:$0xf] %v445_v52 }
  0x4a   : > { %448 = vst [vmem:[%s418_s15 + $0x14] sm:$0xf] %v447_v53 }
  0x4b PF: > { %498 = sbr.rel (!%p2920_p3) target bundleno = 95 (0x5f), region = 100  ;;  %s500_s18 = sand.u32 (%p2920_p3), 1, %s2834_s10  }
  0x4c   : > { %s2599_s19 = sshll.u32 (%p2920_p3), %s2838_s11, 6  ;;  %s2331_s20 = sshll.u32 (%p2920_p3), %s500_s18, 7 }
  0x4d   : > { %s3046_s23 = scalar_lea.vmem (%p2920_p3), %s3403_s6, %s2599_s19  ;;  %s502_s17 = scalar_lea.vmem (%p2920_p3), [#allocation4], %s2331_s20 }
  0x4e   : > { %v518_v54 = vld [vmem:[%s3046_s23] sm:$0xff] (%p2920_p3)  ;;  %v520_v55 = vld [vmem:[%s3046_s23 + $0x8] sm:$0xff] (%p2920_p3)  ;;  %v522_v56 = vld [vmem:[%s3046_s23 + $0x10] sm:$0xff] (%p2920_p3) }
  0x4f   : > { %519 = vst [vmem:[%s502_s17] sm:$0xff] (%p2920_p3), %v518_v54  ;;  %v524_v57 = vld [vmem:[%s3046_s23 + $0x18] sm:$0xff] (%p2920_p3)  ;;  %v526_v58 = vld [vmem:[%s3046_s23 + $0x20] sm:$0xff] (%p2920_p3)  ;;  %v528_v59 = vld [vmem:[%s3046_s23 + $0x28] sm:$0xff] (%p2920_p3) }
  0x50   : > { %521 = vst [vmem:[%s502_s17 + $0x8] sm:$0xff] %v520_v55  ;;  %v530_v60 = vld [vmem:[%s3046_s23 + $0x30] sm:$0xff]  ;;  %v532_v61 = vld [vmem:[%s3046_s23 + $0x38] sm:$0xff]  ;;  %v534_v62 = vld [vmem:[%s3046_s23 + $0x80] sm:$0xff] }
  0x51   : > { %523 = vst [vmem:[%s502_s17 + $0x10] sm:$0xff] %v522_v56  ;;  %v536_v63 = vld [vmem:[%s3046_s23 + $0x88] sm:$0xff]  ;;  %v538_v0 = vld [vmem:[%s3046_s23 + $0x90] sm:$0xff]  ;;  %v540_v1 = vld [vmem:[%s3046_s23 + $0x98] sm:$0xff] }
  0x52   : > { %525 = vst [vmem:[%s502_s17 + $0x18] sm:$0xff] %v524_v57  ;;  %v542_v2 = vld [vmem:[%s3046_s23 + $0xa0] sm:$0xff]  ;;  %v544_v3 = vld [vmem:[%s3046_s23 + $0xa8] sm:$0xff]  ;;  %v546_v4 = vld [vmem:[%s3046_s23 + $0xb0] sm:$0xff] }
  0x53   : > { %527 = vst [vmem:[%s502_s17 + $0x20] sm:$0xff] %v526_v58  ;;  %v548_v5 = vld [vmem:[%s3046_s23 + $0xb8] sm:$0xff] }
  0x54   : > { %529 = vst [vmem:[%s502_s17 + $0x28] sm:$0xff] %v528_v59 }
  0x55   : > { %531 = vst [vmem:[%s502_s17 + $0x30] sm:$0xff] %v530_v60 }
  0x56   : > { %533 = vst [vmem:[%s502_s17 + $0x38] sm:$0xff] %v532_v61 }
  0x57   : > { %535 = vst [vmem:[%s502_s17 + $0x40] sm:$0xff] %v534_v62 }
  0x58   : > { %537 = vst [vmem:[%s502_s17 + $0x48] sm:$0xff] %v536_v63 }
  0x59   : > { %539 = vst [vmem:[%s502_s17 + $0x50] sm:$0xff] %v538_v0 }
  0x5a   : > { %541 = vst [vmem:[%s502_s17 + $0x58] sm:$0xff] %v540_v1 }
  0x5b   : > { %543 = vst [vmem:[%s502_s17 + $0x60] sm:$0xff] %v542_v2 }
  0x5c   : > { %545 = vst [vmem:[%s502_s17 + $0x68] sm:$0xff] %v544_v3 }
  0x5d   : > { %547 = vst [vmem:[%s502_s17 + $0x70] sm:$0xff] %v546_v4 }
  0x5e   : > { %549 = vst [vmem:[%s502_s17 + $0x78] sm:$0xff] %v548_v5 }
  0x5f PF: > { %p2334_p5 = scmp.ge.s32.totalorder %s2838_s11, 1  ;;  %p554_p6 = scmp.lt.s32.totalorder %s2838_s11, 3 }
  0x61   : > { %p555_p7 = pnand %p2334_p5, %p554_p6 }
  0x62   : > { %s3067_s24 = sand.u32 (!%p555_p7), 1, %s2830_s30   ;;  %s2336_s23 = sshll.u32 (!%p555_p7), %s2906_s12, 4 }
  0x63   : > { %558 = sbr.rel (%p555_p7) target bundleno = 657 (0x291), region = 123  ;;  %p639_p8 = scmp.lt.s32.totalorder (!%p555_p7), %s2906_s12, 1 }
  0x64   : > { %s2653_s25 = smul.u32 (!%p555_p7), 384, %s3067_s24  ;;  %p635_p9 = scmp.lt.s32.totalorder (!%p555_p7), %s2336_s23, 31 }
  0x65   : > { %s2654_s19 = smul.u32 (!%p555_p7), 24, %s3067_s24  ;;  %s2335_s17 = sshll.u32 (!%p555_p7), %s3067_s24, 7 }
  0x66   : > { %s3070_s26 = scalar_lea.vmem (!%p555_p7), [#allocation2], %s2653_s25  ;;  %s3309_s11 = scalar_lea.vmem (!%p555_p7), [#allocation4], %s2335_s17 }
  0x67   : > { %s570_s20 = scalar_lea.vmem (!%p555_p7), [#allocation3], %s2654_s19 }
  0x68   : > { %v2471_v6 = vld [vmem:[%s3070_s26 + $0x100] sm:$0xf]  ;;  %v2632_v8 = vld [vmem:[%s3070_s26 + $0x104] sm:$0xf]  ;;  %v2479_v11 = vld [vmem:[%s3070_s26 + $0x108] sm:$0xf] }
  0x69   : > { %v2640_v7 = vld [vmem:[%s3070_s26 + $0x13c] sm:$0xf0]  ;;  %v2473_v10 = vld [vmem:[%s3070_s26 + $0x140] sm:$0xf0]  ;;  %v2641_v12 = vld [vmem:[%s3070_s26 + $0x144] sm:$0xf0] }
  0x6a   : > { %v2472_v9 = vor.u32 %v2640_v7, %v2471_v6  ;;  %v2476_v13 = vor.u32 %v2632_v8, %v2473_v10  ;;  %v2480_v14 = vor.u32 %v2641_v12, %v2479_v11  ;;  %v2633_v15 = vld [vmem:[%s3070_s26 + $0x10c] sm:$0xf]  ;;  %v2407_v17 = vld [vmem:[%s3070_s26 + $0x80] sm:$0xf]  ;;  %v2616_v20 = vld [vmem:[%s3070_s26 + $0x84] sm:$0xf] }
  0x6b   : > { %v2481_v16 = vld [vmem:[%s3070_s26 + $0x148] sm:$0xf0]  ;;  %v2624_v19 = vld [vmem:[%s3070_s26 + $0xbc] sm:$0xf0]  ;;  %v2409_v21 = vld [vmem:[%s3070_s26 + $0xc0] sm:$0xf0] }
  0x6c   : > { %964 = vmatpush.bf16.msra.mxu0 %v2472_v9  ;;  %v2484_v18 = vor.u32 %v2633_v15, %v2481_v16  ;;  %983 = vmatpush.bf16.msra.mxu1 %v2476_v13  ;;  %v2408_v22 = vor.u32 %v2624_v19, %v2407_v17  ;;  %v2412_v23 = vor.u32 %v2616_v20, %v2409_v21  ;;  %v2415_v24 = vld [vmem:[%s3070_s26 + $0x88] sm:$0xf]  ;;  %v2617_v26 = vld [vmem:[%s3070_s26 + $0x8c] sm:$0xf]  ;;  %v2343_v29 = vld [vmem:[%s3070_s26] sm:$0xf] }
  0x6d   : > { %1002 = vmatpush.bf16.msra.mxu2 %v2480_v14  ;;  %v2625_v25 = vld [vmem:[%s3070_s26 + $0xc4] sm:$0xf0]  ;;  %v2417_v28 = vld [vmem:[%s3070_s26 + $0xc8] sm:$0xf0]  ;;  %v2608_v30 = vld [vmem:[%s3070_s26 + $0x3c] sm:$0xf0] }
  0x6e   : > { %1021 = vmatpush.bf16.msra.mxu3 %v2484_v18  ;;  %v2416_v27 = vor.u32 %v2625_v25, %v2415_v24  ;;  %v658_v31 = vld [vmem:[%s3397_s0] sm:$0xff]  ;;  %v659_v32 = vld [vmem:[%s3397_s0 + $0x8] sm:$0xff]  ;;  %v2420_v33 = vor.u32 %v2617_v26, %v2417_v28  ;;  %v2344_v37 = vor.u32 %v2608_v30, %v2343_v29  ;;  %v2495_v43 = vld [vmem:[%s3070_s26 + $0x118] sm:$0xf]  ;;  %vm952_vm0 = vcmask 392192   ;;  %s3412_s12 = smov (!%p639_p8, %s2906_s12), 1 }
  0x6f   : > { %v2600_v34 = vld [vmem:[%s3070_s26 + $0x4] sm:$0xf]  ;;  %v2351_v36 = vld [vmem:[%s3070_s26 + $0x8] sm:$0xf]  ;;  %v2601_v39 = vld [vmem:[%s3070_s26 + $0xc] sm:$0xf]  ;;  %v3108_v51 = vpack.c.bf16 %v659_v32, %v658_v31  ;;  %s641_s30 = scalar_lea.vmem %s3402_s5, %s3412_s12 }
  0x70   : > { %v2345_v35 = vld [vmem:[%s3070_s26 + $0x40] sm:$0xf0]  ;;  %965 = vmatpush.bf16.msra.mxu0 %v2408_v22  ;;  %v2609_v38 = vld [vmem:[%s3070_s26 + $0x44] sm:$0xf0]  ;;  %v2353_v40 = vld [vmem:[%s3070_s26 + $0x48] sm:$0xf0]  ;;  %984 = vmatpush.bf16.msra.mxu1 %v2412_v23 }
  0x71   : > { %1003 = vmatpush.bf16.msra.mxu2 %v2416_v27  ;;  %v2348_v41 = vor.u32 %v2600_v34, %v2345_v35  ;;  %v2352_v42 = vor.u32 %v2609_v38, %v2351_v36  ;;  %v2643_v44 = vld [vmem:[%s3070_s26 + $0x154] sm:$0xf0]  ;;  %v2635_v45 = vld [vmem:[%s3070_s26 + $0x11c] sm:$0xf]  ;;  %v2356_v46 = vor.u32 %v2601_v39, %v2353_v40  ;;  %v2487_v49 = vld [vmem:[%s3070_s26 + $0x110] sm:$0xf] }
  0x72   : > { %1022 = vmatpush.bf16.msra.mxu3 %v2420_v33  ;;  %v2496_v47 = vor.u32 %v2643_v44, %v2495_v43  ;;  %v2497_v48 = vld [vmem:[%s3070_s26 + $0x158] sm:$0xf0]  ;;  %v2642_v50 = vld [vmem:[%s3070_s26 + $0x14c] sm:$0xf0]  ;;  %v2634_v53 = vld [vmem:[%s3070_s26 + $0x114] sm:$0xf] }
  0x73   : > { %v2500_v52 = vor.u32 %v2635_v45, %v2497_v48  ;;  %v2489_v54 = vld [vmem:[%s3070_s26 + $0x150] sm:$0xf0]  ;;  %v2431_v55 = vld [vmem:[%s3070_s26 + $0x98] sm:$0xf]  ;;  %v2488_v57 = vor.u32 %v2642_v50, %v2487_v49  ;;  %v2619_v58 = vld [vmem:[%s3070_s26 + $0x9c] sm:$0xf] }
  0x74   : > { %966 = vmatpush.bf16.msra.mxu0 %v2344_v37  ;;  %v2627_v56 = vld [vmem:[%s3070_s26 + $0xd4] sm:$0xf0]  ;;  %985 = vmatpush.bf16.msra.mxu1 %v2348_v41  ;;  %v2492_v59 = vor.u32 %v2634_v53, %v2489_v54  ;;  %v2423_v61 = vld [vmem:[%s3070_s26 + $0x90] sm:$0xf]  ;;  %v2433_v63 = vld [vmem:[%s3070_s26 + $0xd8] sm:$0xf0] }
  0x75   : > { %1004 = vmatpush.bf16.msra.mxu2 %v2352_v42  ;;  %v2432_v60 = vor.u32 %v2627_v56, %v2431_v55  ;;  %v2626_v62 = vld [vmem:[%s3070_s26 + $0xcc] sm:$0xf0]  ;;  %v2618_v0 = vld [vmem:[%s3070_s26 + $0x94] sm:$0xf]  ;;  %v2436_v2 = vor.u32 %v2619_v58, %v2433_v63  ;;  %v2367_v3 = vld [vmem:[%s3070_s26 + $0x18] sm:$0xf] }
  0x76   : > { %1023 = vmatpush.bf16.msra.mxu3 %v2356_v46  ;;  %v2425_v1 = vld [vmem:[%s3070_s26 + $0xd0] sm:$0xf0]  ;;  %v2611_v4 = vld [vmem:[%s3070_s26 + $0x54] sm:$0xf0]  ;;  %v2603_v5 = vld [vmem:[%s3070_s26 + $0x1c] sm:$0xf]  ;;  %v2424_v7 = vor.u32 %v2626_v62, %v2423_v61 }
  0x77   : > { %2533 = vmatmul.msk.bf16.vlgmr.msra.gmra.mxu0 %vm952_vm0, %v3108_v51  ;;  %2535 = vmatmul.msk.bf16.vlgmr.msra.gmra.mxu1 %vm952_vm0, %v3108_v51  ;;  %v2369_v6 = vld [vmem:[%s3070_s26 + $0x58] sm:$0xf0]  ;;  %v2511_v8 = vld [vmem:[%s3070_s26 + $0x128] sm:$0xf]  ;;  %v2428_v10 = vor.u32 %v2618_v0, %v2425_v1  ;;  %v2359_v11 = vld [vmem:[%s3070_s26 + $0x10] sm:$0xf]  ;;  %v2368_v13 = vor.u32 %v2611_v4, %v2367_v3 }
  0x78   : > { %2537 = vmatmul.msk.bf16.vlgmr.msra.gmra.mxu2 %vm952_vm0, %v3108_v51  ;;  %1040 = vmatpush.bf16.msrb.mxu0 %v2488_v57  ;;  %v2645_v9 = vld [vmem:[%s3070_s26 + $0x164] sm:$0xf0]  ;;  %v2610_v12 = vld [vmem:[%s3070_s26 + $0x4c] sm:$0xf0]  ;;  %v2602_v14 = vld [vmem:[%s3070_s26 + $0x14] sm:$0xf]  ;;  %v2372_v16 = vor.u32 %v2603_v5, %v2369_v6 }
  0x79   : > { %1078 = vmatpush.bf16.msrb.mxu2 %v2496_v47  ;;  %2539 = vmatmul.msk.bf16.vlgmr.msra.gmra.mxu3 %vm952_vm0, %v3108_v51  ;;  %v2361_v15 = vld [vmem:[%s3070_s26 + $0x50] sm:$0xf0]  ;;  %v2512_v17 = vor.u32 %v2645_v9, %v2511_v8  ;;  %v2360_v18 = vor.u32 %v2610_v12, %v2359_v11  ;;  %v661_v21 = vld [vmem:[%s3397_s0 + $0x18] sm:$0xff]  ;;  %v2637_v23 = vld [vmem:[%s3070_s26 + $0x12c] sm:$0xf]  ;;  %vm1411_vm1 = vcmask 261120  }
  0x7a   : > { %1097 = vmatpush.bf16.msrb.mxu3 %v2500_v52  ;;  %1059 = vmatpush.bf16.msrb.mxu1 %v2492_v59  ;;  %v2364_v19 = vor.u32 %v2602_v14, %v2361_v15  ;;  %v660_v20 = vld [vmem:[%s3397_s0 + $0x10] sm:$0xff]  ;;  %v2513_v24 = vld [vmem:[%s3070_s26 + $0x168] sm:$0xf0]  ;;  %v2503_v25 = vld [vmem:[%s3070_s26 + $0x120] sm:$0xf]  ;;  %s3414_s23 = smov (!%p635_p9, %s2336_s23), 31 }
  0x7b   : > { %v3144_v22 = vpack.c.bf16 %v661_v21, %v660_v20  ;;  %v2516_v26 = vor.u32 %v2637_v23, %v2513_v24  ;;  %v2644_v27 = vld [vmem:[%s3070_s26 + $0x15c] sm:$0xf0]  ;;  %v2636_v28 = vld [vmem:[%s3070_s26 + $0x124] sm:$0xf]  ;;  %v2447_v32 = vld [vmem:[%s3070_s26 + $0xa8] sm:$0xf]  ;;  %s3318_s24 = scalar_lea.vmem %s3401_s4, %s3414_s23 }
  0x7c   : > { %1041 = vmatpush.bf16.msrb.mxu0 %v2424_v7  ;;  %v2505_v29 = vld [vmem:[%s3070_s26 + $0x160] sm:$0xf0]  ;;  %v2504_v30 = vor.u32 %v2644_v27, %v2503_v25  ;;  %v2629_v33 = vld [vmem:[%s3070_s26 + $0xe4] sm:$0xf0]  ;;  %v2439_v34 = vld [vmem:[%s3070_s26 + $0xa0] sm:$0xf] }
  0x7d   : > { %1079 = vmatpush.bf16.msrb.mxu2 %v2432_v60  ;;  %v2508_v31 = vor.u32 %v2636_v28, %v2505_v29  ;;  %v2448_v35 = vor.u32 %v2629_v33, %v2447_v32  ;;  %v2628_v36 = vld [vmem:[%s3070_s26 + $0xdc] sm:$0xf0]  ;;  %v2620_v37 = vld [vmem:[%s3070_s26 + $0xa4] sm:$0xf]  ;;  %v2621_v41 = vld [vmem:[%s3070_s26 + $0xac] sm:$0xf] }
  0x7e   : > { %1098 = vmatpush.bf16.msrb.mxu3 %v2436_v2  ;;  %1060 = vmatpush.bf16.msrb.mxu1 %v2428_v10  ;;  %v2441_v38 = vld [vmem:[%s3070_s26 + $0xe0] sm:$0xf0]  ;;  %v2440_v39 = vor.u32 %v2628_v36, %v2439_v34  ;;  %v2449_v42 = vld [vmem:[%s3070_s26 + $0xe8] sm:$0xf0]  ;;  %v2375_v43 = vld [vmem:[%s3070_s26 + $0x20] sm:$0xf] }
  0x7f   : > { %v2444_v40 = vor.u32 %v2620_v37, %v2441_v38  ;;  %v2452_v44 = vor.u32 %v2621_v41, %v2449_v42  ;;  %v2612_v45 = vld [vmem:[%s3070_s26 + $0x5c] sm:$0xf0]  ;;  %v2604_v46 = vld [vmem:[%s3070_s26 + $0x24] sm:$0xf]  ;;  %v2383_v48 = vld [vmem:[%s3070_s26 + $0x28] sm:$0xf] }
  0x80   : > { %1042 = vmatpush.bf16.msrb.mxu0 %v2360_v18  ;;  %v2377_v47 = vld [vmem:[%s3070_s26 + $0x60] sm:$0xf0]  ;;  %v2613_v49 = vld [vmem:[%s3070_s26 + $0x64] sm:$0xf0]  ;;  %v2605_v50 = vld [vmem:[%s3070_s26 + $0x2c] sm:$0xf]  ;;  %v2376_v54 = vor.u32 %v2612_v45, %v2375_v43 }
  0x81   : > { %1080 = vmatpush.bf16.msrb.mxu2 %v2368_v13  ;;  %v2384_v52 = vor.u32 %v2613_v49, %v2383_v48  ;;  %v2385_v53 = vld [vmem:[%s3070_s26 + $0x68] sm:$0xf0]  ;;  %v2380_v55 = vor.u32 %v2604_v46, %v2377_v47  ;;  %v2527_v57 = vld [vmem:[%s3070_s26 + $0x138] sm:$0xf]  ;;  %v2639_v60 = vld [vmem:[%s3070_s26 + $0x13c] sm:$0xf] }
  0x82   : > { %1099 = vmatpush.bf16.msrb.mxu3 %v2372_v16  ;;  %1061 = vmatpush.bf16.msrb.mxu1 %v2364_v19  ;;  %v2388_v56 = vor.u32 %v2605_v50, %v2385_v53  ;;  %v2647_v58 = vld [vmem:[%s3070_s26 + $0x174] sm:$0xf0]  ;;  %v2529_v61 = vld [vmem:[%s3070_s26 + $0x178] sm:$0xf0]  ;;  %v2519_v62 = vld [vmem:[%s3070_s26 + $0x130] sm:$0xf] }
  0x83   : > { %v2528_v59 = vor.u32 %v2647_v58, %v2527_v57  ;;  %v2532_v63 = vor.u32 %v2639_v60, %v2529_v61  ;;  %v2646_v0 = vld [vmem:[%s3070_s26 + $0x16c] sm:$0xf0]  ;;  %v2638_v1 = vld [vmem:[%s3070_s26 + $0x134] sm:$0xf]  ;;  %v2463_v5 = vld [vmem:[%s3070_s26 + $0xb8] sm:$0xf] }
  0x84   : > { %1116 = vmatpush.bf16.msra.mxu0 %v2504_v30  ;;  %v2521_v2 = vld [vmem:[%s3070_s26 + $0x170] sm:$0xf0]  ;;  %v2520_v3 = vor.u32 %v2646_v0, %v2519_v62  ;;  %v2631_v6 = vld [vmem:[%s3070_s26 + $0xf4] sm:$0xf0]  ;;  %v2455_v7 = vld [vmem:[%s3070_s26 + $0xb0] sm:$0xf] }
  0x85   : > { %1154 = vmatpush.bf16.msra.mxu2 %v2512_v17  ;;  %v2524_v4 = vor.u32 %v2638_v1, %v2521_v2  ;;  %v2464_v8 = vor.u32 %v2631_v6, %v2463_v5  ;;  %v2630_v9 = vld [vmem:[%s3070_s26 + $0xec] sm:$0xf0]  ;;  %v2622_v10 = vld [vmem:[%s3070_s26 + $0xb4] sm:$0xf]  ;;  %v2623_v14 = vld [vmem:[%s3070_s26 + $0xbc] sm:$0xf] }
  0x86   : > { %1173 = vmatpush.bf16.msra.mxu3 %v2516_v26  ;;  %1135 = vmatpush.bf16.msra.mxu1 %v2508_v31  ;;  %v2457_v11 = vld [vmem:[%s3070_s26 + $0xf0] sm:$0xf0]  ;;  %v2456_v12 = vor.u32 %v2630_v9, %v2455_v7  ;;  %v2465_v15 = vld [vmem:[%s3070_s26 + $0xf8] sm:$0xf0]  ;;  %v2391_v16 = vld [vmem:[%s3070_s26 + $0x30] sm:$0xf] }
  0x87   : > { %2534 = vmatmul.msk.bf16.gmra.mxu0 %vm952_vm0, %v3144_v22  ;;  %2536 = vmatmul.msk.bf16.gmra.mxu1 %vm952_vm0, %v3144_v22  ;;  %v2460_v13 = vor.u32 %v2622_v10, %v2457_v11  ;;  %v2468_v17 = vor.u32 %v2623_v14, %v2465_v15  ;;  %v2614_v18 = vld [vmem:[%s3070_s26 + $0x6c] sm:$0xf0]  ;;  %v2606_v19 = vld [vmem:[%s3070_s26 + $0x34] sm:$0xf]  ;;  %v2399_v21 = vld [vmem:[%s3070_s26 + $0x38] sm:$0xf] }
  0x88   : > { %2538 = vmatmul.msk.bf16.gmra.mxu2 %vm952_vm0, %v3144_v22  ;;  %1117 = vmatpush.bf16.msra.mxu0 %v2440_v39  ;;  %v2393_v20 = vld [vmem:[%s3070_s26 + $0x70] sm:$0xf0]  ;;  %v2615_v23 = vld [vmem:[%s3070_s26 + $0x74] sm:$0xf0]  ;;  %v2607_v24 = vld [vmem:[%s3070_s26 + $0x3c] sm:$0xf]  ;;  %v2392_v27 = vor.u32 %v2614_v18, %v2391_v16 }
  0x89   : > { %2540 = vmatmul.msk.bf16.gmra.mxu3 %vm952_vm0, %v3144_v22  ;;  %1155 = vmatpush.bf16.msra.mxu2 %v2448_v35  ;;  %v2400_v25 = vor.u32 %v2615_v23, %v2399_v21  ;;  %v2401_v26 = vld [vmem:[%s3070_s26 + $0x78] sm:$0xf0]  ;;  %v2396_v28 = vor.u32 %v2606_v19, %v2393_v20  ;;  %v2650_v36 = vld [vmem:[%s570_s20 + $0x10] sm:$0xff]  ;;  %v2649_v41 = vld [vmem:[%s570_s20 + $0x8] sm:$0xff]  ;;  %s2339_s29 = sshll.u32 %s3414_s23, 3  ;;  %s2337_s19 = sshll.u32 %s3412_s12, 3 }
  0x8a   : > { %1174 = vmatpush.bf16.msra.mxu3 %v2452_v44  ;;  %1136 = vmatpush.bf16.msra.mxu1 %v2444_v40  ;;  %v2404_v29 = vor.u32 %v2607_v24, %v2401_v26  ;;  %v2648_v42 = vld [vmem:[%s570_s20] sm:$0xff]  ;;  %s3329_s18 = scalar_lea.vmem %s3405_s8, %s2339_s29  ;;  %s656_s17 = scalar_lea.vmem %s3406_s9, %s2337_s19  ;;  %vm2144_vm2 = vcmask 130048  }
  0x8b   : > { %v3256_v62 = vld [vmem:[%s3400_s3] sm:$0xff] }
  0x8c   : > { %1118 = vmatpush.bf16.msra.mxu0 %v2376_v54 }
  0x8d   : > { %1156 = vmatpush.bf16.msra.mxu2 %v2384_v52 }
  0x8e   : > { %1175 = vmatpush.bf16.msra.mxu3 %v2388_v56  ;;  %1137 = vmatpush.bf16.msra.mxu1 %v2380_v55 }
  0x97   : > { %2541 = vmatmul.msk.bf16.vlgmr.msrb.gmra.mxu0 %vm952_vm0, %v3108_v51  ;;  %2543 = vmatmul.msk.bf16.vlgmr.msrb.gmra.mxu1 %vm952_vm0, %v3108_v51 }
  0x98   : > { %2545 = vmatmul.msk.bf16.vlgmr.msrb.gmra.mxu2 %vm952_vm0, %v3108_v51  ;;  %1192 = vmatpush.bf16.msrb.mxu0 %v2520_v3 }
  0x99   : > { %2547 = vmatmul.msk.bf16.vlgmr.msrb.gmra.mxu3 %vm952_vm0, %v3108_v51  ;;  %1230 = vmatpush.bf16.msrb.mxu2 %v2528_v59 }
  0x9a   : > { %1249 = vmatpush.bf16.msrb.mxu3 %v2532_v63  ;;  %1211 = vmatpush.bf16.msrb.mxu1 %v2524_v4 }
  0x9c   : > { %1193 = vmatpush.bf16.msrb.mxu0 %v2456_v12 }
  0x9d   : > { %1231 = vmatpush.bf16.msrb.mxu2 %v2464_v8 }
  0x9e   : > { %1250 = vmatpush.bf16.msrb.mxu3 %v2468_v17  ;;  %1212 = vmatpush.bf16.msrb.mxu1 %v2460_v13 }
  0xa0   : > { %1194 = vmatpush.bf16.msrb.mxu0 %v2392_v27 }
  0xa1   : > { %1232 = vmatpush.bf16.msrb.mxu2 %v2400_v25 }
  0xa2   : > { %1251 = vmatpush.bf16.msrb.mxu3 %v2404_v29  ;;  %1213 = vmatpush.bf16.msrb.mxu1 %v2396_v28 }
  0xa7   : > { %2542 = vmatmul.msk.bf16.gmra.mxu0 %vm952_vm0, %v3144_v22  ;;  %2544 = vmatmul.msk.bf16.gmra.mxu1 %vm952_vm0, %v3144_v22 }
  0xa8   : > { %2546 = vmatmul.msk.bf16.gmra.mxu2 %vm952_vm0, %v3144_v22 }
  0xa9   : > { %2548 = vmatmul.msk.bf16.gmra.mxu3 %vm952_vm0, %v3144_v22 }
  0xb7   : > { %2549 = vmatmul.msk.bf16.vlgmr.msra.gmra.mxu0 %vm952_vm0, %v3108_v51  ;;  %2551 = vmatmul.msk.bf16.vlgmr.msra.gmra.mxu1 %vm952_vm0, %v3108_v51 }
  0xb8   : > { %2553 = vmatmul.msk.bf16.vlgmr.msra.gmra.mxu2 %vm952_vm0, %v3108_v51  ;;  %1356 = vmatpush.bf16.msra.mxu0 %v2650_v36 }
  0xb9   : > { %2555 = vmatmul.msk.bf16.vlgmr.msra.gmra.mxu3 %vm952_vm0, %v3108_v51 }
  0xbc   : > { %1357 = vmatpush.bf16.msra.mxu0 %v2649_v41 }
  0xc0   : > { %1358 = vmatpush.bf16.msra.mxu0 %v2648_v42 }
  0xc7   : > { %2550 = vmatmul.msk.bf16.gmra.mxu0 %vm952_vm0, %v3144_v22  ;;  %2552 = vmatmul.msk.bf16.gmra.mxu1 %vm952_vm0, %v3144_v22 }
  0xc8   : > { %2554 = vmatmul.msk.bf16.gmra.mxu2 %vm952_vm0, %v3144_v22 }
  0xc9   : > { %2556 = vmatmul.msk.bf16.gmra.mxu3 %vm952_vm0, %v3144_v22 }
  0xd7   : > { %2557 = vmatmul.msk.bf16.vlgmr.msrb.gmra.mxu0 %vm952_vm0, %v3108_v51  ;;  %2559 = vmatmul.msk.bf16.vlgmr.msrb.gmra.mxu1 %vm952_vm0, %v3108_v51 }
  0xd8   : > { %2561 = vmatmul.msk.bf16.vlgmr.msrb.gmra.mxu2 %vm952_vm0, %v3108_v51 }
  0xd9   : > { %2563 = vmatmul.msk.bf16.vlgmr.msrb.gmra.mxu3 %vm952_vm0, %v3108_v51 }
  0xe7   : > { %2558 = vmatmul.msk.bf16.gmra.mxu0 %vm952_vm0, %v3144_v22  ;;  %2560 = vmatmul.msk.bf16.gmra.mxu1 %vm952_vm0, %v3144_v22 }
  0xe8   : > { %2562 = vmatmul.msk.bf16.gmra.mxu2 %vm952_vm0, %v3144_v22 }
  0xe9   : > { %2564 = vmatmul.msk.bf16.gmra.mxu3 %vm952_vm0, %v3144_v22 }
  0xf4   : > { %v968_v30 = vpop.f32.mrf.mxu0  ;;  %v987_v31 = vpop.f32.mrf.mxu1 }
  0xf7   : > { %2577 = vmatmul.msk.bf16.vlgmr.msra.gmra.mxu0 %vm952_vm0, %v3108_v51 }
  0xfb   : > { %v1006_v32 = vpop.f32.mrf.mxu2 }
  0xfc   : > { %v1025_v33 = vpop.f32.mrf.mxu3  ;;  %v970_v34 = vpop.f32.mrf.mxu0 }
  0xfd   : > { %v989_v35 = vpop.f32.mrf.mxu1 }
 0x103   : > { %v1008_v37 = vpop.f32.mrf.mxu2 }
 0x104   : > { %v1027_v38 = vpop.f32.mrf.mxu3  ;;  %v973_v39 = vpop.f32.mrf.mxu0 }
 0x105   : > { %v992_v40 = vpop.f32.mrf.mxu1  ;;  %2680 = vtanh.f32 %v973_v39 }
 0x106   : > { %2682 = vtanh.f32 %v992_v40 }
 0x107   : > { %2578 = vmatmul.msk.bf16.gmra.mxu0 %vm952_vm0, %v3144_v22 }
 0x10b   : > { %v1011_v43 = vpop.f32.mrf.mxu2  ;;  %v2681_v47 = vpop.eup %2680 }
 0x10c   : > { %v1030_v44 = vpop.f32.mrf.mxu3  ;;  %v975_v45 = vpop.f32.mrf.mxu0 }
 0x10d   : > { %v994_v46 = vpop.f32.mrf.mxu1  ;;  %2684 = vtanh.f32 %v975_v45  ;;  %v2683_v48 = vpop.eup %2682 }
 0x10e   : > { %2686 = vtanh.f32 %v994_v46 }
 0x10f   : > { %2688 = vtanh.f32 %v968_v30 }
 0x110   : > { %2690 = vtanh.f32 %v987_v31 }
 0x111   : > { %2692 = vtanh.f32 %v970_v34 }
 0x112   : > { %2694 = vtanh.f32 %v989_v35 }
 0x113   : > { %v1013_v49 = vpop.f32.mrf.mxu2  ;;  %v2685_v50 = vpop.eup %2684 }
 0x114   : > { %2696 = vtanh.f32 %v1013_v49  ;;  %v1032_v52 = vpop.f32.mrf.mxu3  ;;  %v1044_v53 = vpop.f32.mrf.mxu0  ;;  %1427 = vmatpush.msra.mxu1 %v2685_v50 }
 0x115   : > { %v2687_v54 = vpop.eup %2686  ;;  %2698 = vtanh.f32 %v1032_v52  ;;  %v1063_v55 = vpop.f32.mrf.mxu1 }
 0x116   : > { %v2689_v56 = vpop.eup %2688  ;;  %2700 = vtanh.f32 %v1011_v43  ;;  %1447 = vmatpush.msra.mxu2 %v2687_v54  ;;  %1428 = vmatpush.msra.mxu1 %v2681_v47 }
 0x117   : > { %v2691_v57 = vpop.eup %2690  ;;  %2702 = vtanh.f32 %v1030_v44 }
 0x118   : > { %v2693_v51 = vpop.eup %2692  ;;  %2704 = vtanh.f32 %v1008_v37  ;;  %1448 = vmatpush.msra.mxu2 %v2683_v48 }
 0x119   : > { %v2695_v58 = vpop.eup %2694  ;;  %2706 = vtanh.f32 %v1027_v38  ;;  %1429 = vmatpush.msra.mxu1 %v2693_v51 }
 0x11a   : > { %v2697_v59 = vpop.eup %2696  ;;  %2708 = vtanh.f32 %v1006_v32  ;;  %1449 = vmatpush.msra.mxu2 %v2695_v58 }
 0x11b   : > { %v2699_v60 = vpop.eup %2698  ;;  %2710 = vtanh.f32 %v1025_v33  ;;  %v3251_v61 = vpop.f32.mrf.mxu2  ;;  %1430 = vmatpush.msra.mxu1 %v2689_v56  ;;  %1467 = vmatpush.msra.mxu3 %v2697_v59 }
 0x11c   : > { %v2701_v63 = vpop.eup %2700  ;;  %v3258_v0 = vpop.f32.mrf.mxu3  ;;  %1450 = vmatpush.msra.mxu2 %v2691_v57  ;;  %2579 = vmatmul.msk.f32.vlgmr.msra.gmra.mxu1 %vm1411_vm1, %v3256_v62 }
 0x11d   : > { %1487 = vmatpush.msrb.mxu1 %v2699_v60  ;;  %v1046_v1 = vpop.f32.mrf.mxu0  ;;  %v2703_v2 = vpop.eup %2702  ;;  %1468 = vmatpush.msra.mxu3 %v2701_v63 }
 0x11e   : > { %v1065_v3 = vpop.f32.mrf.mxu1  ;;  %v2705_v4 = vpop.eup %2704  ;;  %2580 = vmatmul.msk.f32.vlgmr.msra.gmra.mxu2 %vm1411_vm1, %v3256_v62 }
 0x11f   : > { %1488 = vmatpush.msrb.mxu1 %v2703_v2  ;;  %v2707_v5 = vpop.eup %2706  ;;  %1469 = vmatpush.msra.mxu3 %v2705_v4 }
 0x120   : > { %v2709_v6 = vpop.eup %2708 }
 0x121   : > { %1489 = vmatpush.msrb.mxu1 %v2707_v5  ;;  %v2711_v7 = vpop.eup %2710  ;;  %1470 = vmatpush.msra.mxu3 %v2709_v6 }
 0x122   : > { %2581 = vmatmul.msk.f32.vlgmr.msra.gmra.mxu3 %vm1411_vm1, %v3256_v62 }
 0x123   : > { %1490 = vmatpush.msrb.mxu1 %v2711_v7  ;;  %v1084_v8 = vpop.f32.mrf.mxu2 }
 0x124   : > { %v1103_v9 = vpop.f32.mrf.mxu3  ;;  %2582 = vmatmul.msk.f32.vlgmr.msrb.gmra.mxu1 %vm1411_vm1, %v3256_v62 }
 0x125   : > { %v1049_v10 = vpop.f32.mrf.mxu0 }
 0x126   : > { %v1068_v11 = vpop.f32.mrf.mxu1  ;;  %2712 = vtanh.f32 %v1049_v10 }
 0x127   : > { %2714 = vtanh.f32 %v1068_v11 }
 0x12b   : > { %v1087_v12 = vpop.f32.mrf.mxu2 }
 0x12c   : > { %v1106_v13 = vpop.f32.mrf.mxu3  ;;  %v2713_v15 = vpop.eup %2712 }
 0x12d   : > { %v1051_v14 = vpop.f32.mrf.mxu0  ;;  %v2715_v16 = vpop.eup %2714 }
 0x12e   : > { %v1070_v22 = vpop.f32.mrf.mxu1  ;;  %2716 = vtanh.f32 %v1051_v14 }
 0x12f   : > { %2718 = vtanh.f32 %v1070_v22 }
 0x130   : > { %2720 = vtanh.f32 %v1044_v53 }
 0x131   : > { %2722 = vtanh.f32 %v1063_v55 }
 0x132   : > { %2724 = vtanh.f32 %v1046_v1 }
 0x133   : > { %2726 = vtanh.f32 %v1065_v3  ;;  %v1089_v17 = vpop.f32.mrf.mxu2 }
 0x134   : > { %v2717_v18 = vpop.eup %2716  ;;  %2728 = vtanh.f32 %v1089_v17  ;;  %v1108_v19 = vpop.f32.mrf.mxu3 }
 0x135   : > { %v1120_v20 = vpop.f32.mrf.mxu0  ;;  %v2719_v21 = vpop.eup %2718  ;;  %2730 = vtanh.f32 %v1108_v19  ;;  %1507 = vmatpush.msrb.mxu2 %v2717_v18 }
 0x136   : > { %v1139_v23 = vpop.f32.mrf.mxu1  ;;  %v2721_v24 = vpop.eup %2720  ;;  %2732 = vtanh.f32 %v1087_v12  ;;  %1527 = vmatpush.msrb.mxu3 %v2719_v21 }
 0x137   : > { %v2723_v25 = vpop.eup %2722  ;;  %2734 = vtanh.f32 %v1106_v13  ;;  %1508 = vmatpush.msrb.mxu2 %v2713_v15 }
 0x138   : > { %v2725_v26 = vpop.eup %2724  ;;  %2736 = vtanh.f32 %v1084_v8  ;;  %1528 = vmatpush.msrb.mxu3 %v2715_v16 }
 0x139   : > { %v2727_v27 = vpop.eup %2726  ;;  %2738 = vtanh.f32 %v1103_v9  ;;  %1509 = vmatpush.msrb.mxu2 %v2725_v26 }
 0x13a   : > { %v2729_v28 = vpop.eup %2728  ;;  %2740 = vtanh.f32 %v3251_v61  ;;  %1529 = vmatpush.msrb.mxu3 %v2727_v27 }
 0x13b   : > { %v2731_v29 = vpop.eup %2730  ;;  %2742 = vtanh.f32 %v3258_v0  ;;  %v3272_v30 = vpop.f32.mrf.mxu2  ;;  %1510 = vmatpush.msrb.mxu2 %v2721_v24  ;;  %1547 = vmatpush.msra.mxu1 %v2729_v28 }
 0x13c   : > { %v2733_v31 = vpop.eup %2732  ;;  %v1177_v32 = vpop.f32.mrf.mxu3  ;;  %1530 = vmatpush.msrb.mxu3 %v2723_v25  ;;  %2583 = vmatmul.msk.f32.vlgmr.msrb.gmra.mxu2 %vm1411_vm1, %v3256_v62 }
 0x13d   : > { %1567 = vmatpush.msra.mxu2 %v2731_v29  ;;  %v1122_v33 = vpop.f32.mrf.mxu0  ;;  %v2735_v34 = vpop.eup %2734  ;;  %1548 = vmatpush.msra.mxu1 %v2733_v31 }
 0x13e   : > { %v1141_v35 = vpop.f32.mrf.mxu1  ;;  %v2737_v36 = vpop.eup %2736  ;;  %2584 = vmatmul.msk.f32.vlgmr.msrb.gmra.mxu3 %vm1411_vm1, %v3256_v62 }
 0x13f   : > { %1568 = vmatpush.msra.mxu2 %v2735_v34  ;;  %v2739_v37 = vpop.eup %2738  ;;  %1549 = vmatpush.msra.mxu1 %v2737_v36  ;;  %v1784_v36 = vld [vmem:[%s3309_s11 + $0x40] sm:$0xff] }
 0x140   : > { %v2741_v38 = vpop.eup %2740 }
 0x141   : > { %1569 = vmatpush.msra.mxu2 %v2739_v37  ;;  %v2743_v39 = vpop.eup %2742  ;;  %1550 = vmatpush.msra.mxu1 %v2741_v38  ;;  %v3313_v37 = vld [vmem:[%s3309_s11 + $0x48] sm:$0xff]  ;;  %v1809_v38 = vunpack.c.h.bf16 %v1784_v36 }
 0x142   : > { %2585 = vmatmul.msk.f32.vlgmr.msra.gmra.mxu1 %vm1411_vm1, %v3256_v62 }
 0x143   : > { %1570 = vmatpush.msra.mxu2 %v2743_v39  ;;  %v1160_v40 = vpop.f32.mrf.mxu2  ;;  %v1810_v39 = vunpack.c.l.bf16 %v3313_v37 }
 0x144   : > { %v1179_v41 = vpop.f32.mrf.mxu3  ;;  %2586 = vmatmul.msk.f32.vlgmr.msra.gmra.mxu2 %vm1411_vm1, %v3256_v62 }
 0x145   : > { %v1125_v42 = vpop.f32.mrf.mxu0 }
 0x146   : > { %v1144_v43 = vpop.f32.mrf.mxu1  ;;  %2744 = vtanh.f32 %v1125_v42  ;;  %v1808_v42 = vunpack.c.l.bf16 %v1784_v36  ;;  %v1790_v36 = vld [vmem:[%s3309_s11 + $0x70] sm:$0xff] }
 0x147   : > { %2746 = vtanh.f32 %v1144_v43 }
 0x14b   : > { %v1163_v44 = vpop.f32.mrf.mxu2 }
 0x14c   : > { %v1182_v45 = vpop.f32.mrf.mxu3  ;;  %v2745_v48 = vpop.eup %2744 }
 0x14d   : > { %v1127_v46 = vpop.f32.mrf.mxu0  ;;  %v2747_v49 = vpop.eup %2746 }
 0x14e   : > { %v1146_v47 = vpop.f32.mrf.mxu1  ;;  %2748 = vtanh.f32 %v1127_v46 }
 0x14f   : > { %2750 = vtanh.f32 %v1146_v47 }
 0x150   : > { %2752 = vtanh.f32 %v1120_v20 }
 0x151   : > { %2754 = vtanh.f32 %v1139_v23 }
 0x152   : > { %2756 = vtanh.f32 %v1122_v33 }
 0x153   : > { %2758 = vtanh.f32 %v1141_v35  ;;  %v1165_v50 = vpop.f32.mrf.mxu2 }
 0x154   : > { %v2749_v52 = vpop.eup %2748  ;;  %2760 = vtanh.f32 %v1165_v50  ;;  %v1184_v53 = vpop.f32.mrf.mxu3 }
 0x155   : > { %v1196_v54 = vpop.f32.mrf.mxu0  ;;  %v2751_v55 = vpop.eup %2750  ;;  %2762 = vtanh.f32 %v1184_v53  ;;  %1587 = vmatpush.msra.mxu3 %v2749_v52 }
 0x156   : > { %v1215_v56 = vpop.f32.mrf.mxu1  ;;  %v2753_v57 = vpop.eup %2752  ;;  %2764 = vtanh.f32 %v1163_v44  ;;  %1607 = vmatpush.msrb.mxu1 %v2751_v55  ;;  %v3323_v44 = vld [vmem:[%s3318_s24] sm:$0xff] }
 0x157   : > { %v2755_v51 = vpop.eup %2754  ;;  %2766 = vtanh.f32 %v1182_v45  ;;  %1588 = vmatpush.msra.mxu3 %v2745_v48  ;;  %v1379_v45 = vperm.slane %v3323_v44, 0  ;;  %v1382_v50 = vperm.slane %v3323_v44, 3 }
 0x158   : > { %v2757_v58 = vpop.eup %2756  ;;  %2768 = vtanh.f32 %v1160_v40  ;;  %1608 = vmatpush.msrb.mxu1 %v2747_v49  ;;  %v1776_v40 = vld [vmem:[%s3309_s11] sm:$0xff]  ;;  %v1380_v49 = vperm.slane %v3323_v44, 1 }
 0x159   : > { %v2759_v59 = vpop.eup %2758  ;;  %2770 = vtanh.f32 %v1179_v41  ;;  %1589 = vmatpush.msra.mxu3 %v2757_v58  ;;  %v1793_v43 = vunpack.c.h.bf16 %v1776_v40  ;;  %v1786_v58 = vld [vmem:[%s3309_s11 + $0x50] sm:$0xff] }
 0x15a   : > { %v2761_v60 = vpop.eup %2760  ;;  %2772 = vtanh.f32 %v3272_v30  ;;  %1609 = vmatpush.msrb.mxu1 %v2759_v59  ;;  %v1787_v59 = vld [vmem:[%s3309_s11 + $0x58] sm:$0xff] }
 0x15b   : > { %v2763_v61 = vpop.eup %2762  ;;  %2774 = vtanh.f32 %v1177_v32  ;;  %v1234_v63 = vpop.f32.mrf.mxu2  ;;  %1590 = vmatpush.msra.mxu3 %v2753_v57  ;;  %1627 = vmatpush.msrb.mxu2 %v2761_v60  ;;  %v1777_v57 = vld [vmem:[%s3309_s11 + $0x8] sm:$0xff] }
 0x15c   : > { %v2765_v0 = vpop.eup %2764  ;;  %v1253_v1 = vpop.f32.mrf.mxu3  ;;  %1610 = vmatpush.msrb.mxu1 %v2755_v51  ;;  %2587 = vmatmul.msk.f32.vlgmr.msra.gmra.mxu3 %vm1411_vm1, %v3256_v62  ;;  %v1792_v51 = vunpack.c.l.bf16 %v1776_v40  ;;  %v1821_v40 = vunpack.c.h.bf16 %v1790_v36 }
 0x15d   : > { %1647 = vmatpush.msrb.mxu3 %v2763_v61  ;;  %v1198_v2 = vpop.f32.mrf.mxu0  ;;  %v2767_v3 = vpop.eup %2766  ;;  %1628 = vmatpush.msrb.mxu2 %v2765_v0  ;;  %v1794_v61 = vunpack.c.l.bf16 %v1777_v57  ;;  %v1814_v0 = vunpack.c.l.bf16 %v1787_v59 }
 0x15e   : > { %v1217_v4 = vpop.f32.mrf.mxu1  ;;  %v2769_v5 = vpop.eup %2768  ;;  %2588 = vmatmul.msk.f32.vlgmr.msrb.gmra.mxu1 %vm1411_vm1, %v3256_v62 }
 0x15f   : > { %1648 = vmatpush.msrb.mxu3 %v2767_v3  ;;  %v2771_v6 = vpop.eup %2770  ;;  %1629 = vmatpush.msrb.mxu2 %v2769_v5  ;;  %v1812_v3 = vunpack.c.l.bf16 %v1786_v58 }
 0x160   : > { %v2773_v7 = vpop.eup %2772 }
 0x161   : > { %1649 = vmatpush.msrb.mxu3 %v2771_v6  ;;  %v2775_v8 = vpop.eup %2774  ;;  %1630 = vmatpush.msrb.mxu2 %v2773_v7 }
 0x162   : > { %2589 = vmatmul.msk.f32.vlgmr.msrb.gmra.mxu2 %vm1411_vm1, %v3256_v62 }
 0x163   : > { %1650 = vmatpush.msrb.mxu3 %v2775_v8  ;;  %v1236_v9 = vpop.f32.mrf.mxu2  ;;  %v1779_v8 = vld [vmem:[%s3309_s11 + $0x18] sm:$0xff] }
 0x164   : > { %v1255_v10 = vpop.f32.mrf.mxu3  ;;  %2590 = vmatmul.msk.f32.vlgmr.msrb.gmra.mxu3 %vm1411_vm1, %v3256_v62 }
 0x165   : > { %v1201_v11 = vpop.f32.mrf.mxu0 }
 0x166   : > { %v1220_v12 = vpop.f32.mrf.mxu1  ;;  %2776 = vtanh.f32 %v1201_v11  ;;  %v1789_v11 = vld [vmem:[%s3309_s11 + $0x68] sm:$0xff] }
 0x167   : > { %2778 = vtanh.f32 %v1220_v12  ;;  %v1798_v12 = vunpack.c.l.bf16 %v1779_v8 }
 0x16b   : > { %v1239_v13 = vpop.f32.mrf.mxu2 }
 0x16c   : > { %v1258_v14 = vpop.f32.mrf.mxu3  ;;  %v2777_v16 = vpop.eup %2776 }
 0x16d   : > { %v1203_v22 = vpop.f32.mrf.mxu0  ;;  %v2779_v17 = vpop.eup %2778 }
 0x16e   : > { %v1222_v15 = vpop.f32.mrf.mxu1  ;;  %2780 = vtanh.f32 %v1203_v22 }
 0x16f   : > { %2782 = vtanh.f32 %v1222_v15 }
 0x170   : > { %2784 = vtanh.f32 %v1196_v54  ;;  %v1381_v54 = vperm.slane %v3323_v44, 2 }
 0x171   : > { %2786 = vtanh.f32 %v1215_v56 }
 0x172   : > { %2788 = vtanh.f32 %v1198_v2 }
 0x173   : > { %2790 = vtanh.f32 %v1217_v4  ;;  %v1241_v18 = vpop.f32.mrf.mxu2 }
 0x174   : > { %v2781_v19 = vpop.eup %2780  ;;  %2792 = vtanh.f32 %v1241_v18  ;;  %v1260_v20 = vpop.f32.mrf.mxu3  ;;  %v1815_v18 = vunpack.c.h.bf16 %v1787_v59 }
 0x175   : > { %v2783_v21 = vpop.eup %2782  ;;  %2794 = vtanh.f32 %v1260_v20  ;;  %1667 = vmatpush.msrb.mxu0 %v2781_v19  ;;  %v1360_v35 = vpop.f32.mrf.mxu0  ;;  %v1385_v19 = vperm.slane %v3323_v44, 6  ;;  %v1383_v20 = vperm.slane %v3323_v44, 4 }
 0x176   : > { %v2785_v23 = vpop.eup %2784  ;;  %2796 = vtanh.f32 %v1239_v13  ;;  %1687 = vmatpush.msra.mxu1 %v2783_v21  ;;  %v1384_v21 = vperm.slane %v3323_v44, 5 }
 0x177   : > { %v2787_v24 = vpop.eup %2786  ;;  %2798 = vtanh.f32 %v1258_v14  ;;  %1668 = vmatpush.msrb.mxu0 %v2777_v16  ;;  %v1818_v14 = vunpack.c.l.bf16 %v1789_v11  ;;  %v1811_v16 = vunpack.c.h.bf16 %v3313_v37  ;;  %v1819_v37 = vunpack.c.h.bf16 %v1789_v11 }
 0x178   : > { %v2789_v25 = vpop.eup %2788  ;;  %2800 = vtanh.f32 %v1236_v9  ;;  %1688 = vmatpush.msra.mxu1 %v2779_v17  ;;  %v1795_v17 = vunpack.c.h.bf16 %v1777_v57  ;;  %v1783_v57 = vld [vmem:[%s3309_s11 + $0x38] sm:$0xff] }
 0x179   : > { %v2791_v26 = vpop.eup %2790  ;;  %2802 = vtanh.f32 %v1255_v10  ;;  %1669 = vmatpush.msrb.mxu0 %v2789_v25  ;;  %v1788_v10 = vld [vmem:[%s3309_s11 + $0x60] sm:$0xff]  ;;  %v1806_v59 = vunpack.c.l.bf16 %v1783_v57 }
 0x17a   : > { %v2793_v27 = vpop.eup %2792  ;;  %2804 = vtanh.f32 %v1234_v63  ;;  %1689 = vmatpush.msra.mxu1 %v2791_v26  ;;  %v1813_v63 = vunpack.c.h.bf16 %v1786_v58  ;;  %v1817_v13 = vunpack.c.h.bf16 %v1788_v10 }
 0x17b   : > { %v2795_v28 = vpop.eup %2794  ;;  %2806 = vtanh.f32 %v1253_v1  ;;  %1670 = vmatpush.msrb.mxu0 %v2785_v23  ;;  %1707 = vmatpush.msra.mxu2 %v2793_v27  ;;  %v1778_v1 = vld [vmem:[%s3309_s11 + $0x10] sm:$0xff]  ;;  %v1816_v23 = vunpack.c.l.bf16 %v1788_v10 }
 0x17c   : > { %v2797_v29 = vpop.eup %2796  ;;  %1690 = vmatpush.msra.mxu1 %v2787_v24  ;;  %1727 = vmatpush.msra.mxu3 %v2795_v28  ;;  %v1797_v5 = vunpack.c.h.bf16 %v1778_v1  ;;  %v1796_v9 = vunpack.c.l.bf16 %v1778_v1  ;;  %v1780_v24 = vld [vmem:[%s3309_s11 + $0x20] sm:$0xff]  ;;  %v1807_v1 = vunpack.c.h.bf16 %v1783_v57 }
 0x17d   : > { %v2799_v30 = vpop.eup %2798  ;;  %1708 = vmatpush.msra.mxu2 %v2797_v29  ;;  %2592 = vmatmul.msk.f32.vlgmr.msra.gmra.mxu1 %vm1411_vm1, %v3256_v62  ;;  %v1362_v41 = vpop.f32.mrf.mxu0  ;;  %v1801_v26 = vunpack.c.h.bf16 %v1780_v24 }
 0x17e   : > { %v2801_v31 = vpop.eup %2800  ;;  %1728 = vmatpush.msra.mxu3 %v2799_v30  ;;  %2591 = vmatmul.msk.f32.vlgmr.msrb.gmra.mxu0 %vm1411_vm1, %v3256_v62 }
 0x17f   : > { %v2803_v32 = vpop.eup %2802  ;;  %1709 = vmatpush.msra.mxu2 %v2801_v31  ;;  %1838 = vmatpush.xpose.msrb.mxu1 %v1808_v42  ;;  %v1386_v31 = vperm.slane %v3323_v44, 7  ;;  %v1820_v42 = vunpack.c.l.bf16 %v1790_v36 }
 0x180   : > { %v2805_v33 = vpop.eup %2804  ;;  %1729 = vmatpush.msra.mxu3 %v2803_v32 }
 0x181   : > { %v2807_v34 = vpop.eup %2806  ;;  %1710 = vmatpush.msra.mxu2 %v2805_v33  ;;  %v1799_v33 = vunpack.c.h.bf16 %v1779_v8 }
 0x182   : > { %1730 = vmatpush.msra.mxu3 %v2807_v34  ;;  %2593 = vmatmul.msk.f32.vlgmr.msra.gmra.mxu2 %vm1411_vm1, %v3256_v62  ;;  %v1781_v34 = vld [vmem:[%s3309_s11 + $0x28] sm:$0xff] }
 0x183   : > { %2594 = vmatmul.msk.f32.vlgmr.msra.gmra.mxu3 %vm1411_vm1, %v3256_v62  ;;  %1858 = vmatpush.xpose.msrb.mxu2 %v1809_v38 }
 0x184   : > { %1878 = vmatpush.xpose.msrb.mxu3 %v1810_v39  ;;  %1839 = vmatpush.xpose.msrb.mxu1 %v1792_v51  ;;  %v1802_v39 = vunpack.c.l.bf16 %v1781_v34 }
 0x185   : > { %v1365_v48 = vpop.f32.mrf.mxu0 }
 0x186   : > { %2808 = vtanh.f32 %v1365_v48 }
 0x187   : > { %1859 = vmatpush.xpose.msrb.mxu2 %v1793_v43  ;;  %v1803_v43 = vunpack.c.h.bf16 %v1781_v34 }
 0x188   : > { %1879 = vmatpush.xpose.msrb.mxu3 %v1794_v61  ;;  %1918 = vmatpush.xpose.msra.mxu1 %v1812_v3 }
 0x18b   : > { %1938 = vmatpush.xpose.msra.mxu2 %v1813_v63 }
 0x18c   : > { %1958 = vmatpush.xpose.msra.mxu3 %v1814_v0  ;;  %v2809_v6 = vpop.eup %2808  ;;  %1919 = vmatpush.xpose.msra.mxu1 %v1796_v9 }
 0x18d   : > { %v1367_v60 = vpop.f32.mrf.mxu0 }
 0x18e   : > { %2810 = vtanh.f32 %v1367_v60 }
 0x18f   : > { %2812 = vtanh.f32 %v1362_v41  ;;  %1939 = vmatpush.xpose.msra.mxu2 %v1797_v5  ;;  %v1376_v41 = vld [vmem:[%s3318_s24 + $0x8] sm:$0xff] }
 0x190   : > { %2814 = vtanh.f32 %v1360_v35  ;;  %1959 = vmatpush.xpose.msra.mxu3 %v1798_v12  ;;  %v1800_v35 = vunpack.c.l.bf16 %v1780_v24  ;;  %v1388_v44 = vperm.slane %v1376_v41, 1  ;;  %v1390_v58 = vperm.slane %v1376_v41, 3 }
 0x191   : > { %v1391_v3 = vperm.slane %v1376_v41, 4  ;;  %v1393_v8 = vperm.slane %v1376_v41, 6  ;;  %v1394_v9 = vperm.slane %v1376_v41, 7 }
 0x194   : > { %v2811_v7 = vpop.eup %2810 }
 0x195   : > { %1751 = vmatpush.msra.mxu0 %v2811_v7  ;;  %v2813_v22 = vpop.eup %2812 }
 0x196   : > { %v2815_v15 = vpop.eup %2814 }
 0x197   : > { %1752 = vmatpush.msra.mxu0 %v2809_v6 }
 0x199   : > { %v1432_v46 = vpop.f32.mrf.mxu1  ;;  %1753 = vmatpush.msra.mxu0 %v2813_v22 }
 0x19a   : > { %v1433_v47 = vadd.f32 %v1432_v46, %v1379_v45  ;;  %v1782_v45 = vld [vmem:[%s3309_s11 + $0x30] sm:$0xff] }
 0x19b   : > { %1754 = vmatpush.msra.mxu0 %v2815_v15  ;;  %v1805_v46 = vunpack.c.h.bf16 %v1782_v45 }
 0x19c   : > { %1759 = vst [vmem:[%s3329_s18] sm:$0xff] %v1433_v47  ;;  %1840 = vmatmul.f32.vlgmr.msrb.gmra.mxu1 %v1433_v47  ;;  %2595 = vmatmul.msk.f32.vlgmr.msra.gmra.mxu0 %vm1411_vm1, %v3256_v62  ;;  %v1804_v47 = vunpack.c.l.bf16 %v1782_v45 }
 0x19d   : > { %1898 = vmatpush.xpose.msrb.mxu0 %v1811_v16  ;;  %1998 = vmatpush.xpose.msrb.mxu1 %v1816_v23 }
 0x1a1   : > { %v1452_v52 = vpop.f32.mrf.mxu2  ;;  %v1492_v55 = vpop.f32.mrf.mxu1  ;;  %1899 = vmatpush.xpose.msrb.mxu0 %v1795_v17  ;;  %1999 = vmatpush.xpose.msrb.mxu1 %v1800_v35 }
 0x1a2   : > { %v1453_v53 = vadd.f32 %v1452_v52, %v1380_v49  ;;  %v1493_v56 = vadd.f32 %v1492_v55, %v1382_v50  ;;  %v1387_v50 = vperm.slane %v1376_v41, 0  ;;  %v1791_v52 = vld [vmem:[%s3309_s11 + $0x78] sm:$0xff] }
 0x1a3   : > { %v1823_v63 = vunpack.c.h.bf16 %v1791_v52 }
 0x1a4   : > { %1760 = vst [vmem:[%s3329_s18 + $0x8] sm:$0xff] %v1453_v53  ;;  %1860 = vmatmul.f32.vlgmr.msrb.gmra.mxu2 %v1453_v53  ;;  %1900 = vmatmul.f32.vlgmr.msrb.gmra.mxu0 %v1493_v56  ;;  %v1822_v53 = vunpack.c.l.bf16 %v1791_v52 }
 0x1a5   : > { %v1472_v2 = vpop.f32.mrf.mxu3  ;;  %1762 = vst [vmem:[%s3329_s18 + $0x18] sm:$0xff] %v1493_v56  ;;  %2018 = vmatpush.xpose.msrb.mxu2 %v1817_v13  ;;  %1978 = vmatpush.xpose.msra.mxu0 %v1815_v18  ;;  %v1389_v56 = vperm.slane %v1376_v41, 2 }
 0x1a6   : > { %v1473_v4 = vadd.f32 %v1472_v2, %v1381_v54  ;;  %v1392_v2 = vperm.slane %v1376_v41, 5 }
 0x1a8   : > { %1761 = vst [vmem:[%s3329_s18 + $0x10] sm:$0xff] %v1473_v4  ;;  %1880 = vmatmul.f32.vlgmr.msrb.gmra.mxu3 %v1473_v4 }
 0x1a9   : > { %2038 = vmatpush.xpose.msrb.mxu3 %v1818_v14  ;;  %2019 = vmatpush.xpose.msrb.mxu2 %v1801_v26  ;;  %v2679_v14 = vld [vmem:[%s641_s30] ss:$0 sm:$0xff]  ;;  %s646_s30 = scalar_lea.vmem %s3404_s7, %s2337_s19 }
 0x1aa   : > { %1979 = vmatpush.xpose.msra.mxu0 %v1799_v33 }
 0x1ad   : > { %2039 = vmatpush.xpose.msrb.mxu3 %v1802_v39 }
 0x1ae   : > { %2058 = vmatpush.xpose.msrb.mxu0 %v1819_v37 }
 0x1b2   : > { %2059 = vmatpush.xpose.msrb.mxu0 %v1803_v43 }
 0x1bf   : > { %v1552_v25 = vpop.f32.mrf.mxu1  ;;  %v1512_v62 = vpop.f32.mrf.mxu2 }
 0x1c0   : > { %v1553_v27 = vadd.f32 %v1552_v25, %v1385_v19  ;;  %v1513_v28 = vadd.f32 %v1512_v62, %v1383_v20 }
 0x1c1   : > { %v1532_v29 = vpop.f32.mrf.mxu3 }
 0x1c2   : > { %v1533_v30 = vadd.f32 %v1532_v29, %v1384_v21  ;;  %1765 = vst [vmem:[%s3329_s18 + $0x30] sm:$0xff] %v1553_v27  ;;  %1960 = vmatmul.f32.vlgmr.msra.gmra.mxu3 %v1553_v27  ;;  %1920 = vmatmul.f32.vlgmr.msra.gmra.mxu1 %v1513_v28 }
 0x1c3   : > { %1763 = vst [vmem:[%s3329_s18 + $0x20] sm:$0xff] %v1513_v28  ;;  %2078 = vmatpush.xpose.msra.mxu1 %v1820_v42  ;;  %2118 = vmatpush.xpose.msra.mxu3 %v1822_v53 }
 0x1c4   : > { %1764 = vst [vmem:[%s3329_s18 + $0x28] sm:$0xff] %v1533_v30  ;;  %1940 = vmatmul.f32.vlgmr.msra.gmra.mxu2 %v1533_v30 }
 0x1c5   : > { %2098 = vmatpush.xpose.msra.mxu2 %v1821_v40 }
 0x1c7   : > { %v1572_v32 = vpop.f32.mrf.mxu2  ;;  %2079 = vmatpush.xpose.msra.mxu1 %v1804_v47  ;;  %2119 = vmatpush.xpose.msra.mxu3 %v1806_v59 }
 0x1c8   : > { %v1573_v38 = vadd.f32 %v1572_v32, %v1386_v31 }
 0x1c9   : > { %2099 = vmatpush.xpose.msra.mxu2 %v1805_v46 }
 0x1ca   : > { %1766 = vst [vmem:[%s3329_s18 + $0x38] sm:$0xff] %v1573_v38  ;;  %1980 = vmatmul.f32.vlgmr.msra.gmra.mxu0 %v1573_v38 }
 0x1cb   : > { %2138 = vmatpush.xpose.msra.mxu0 %v1823_v63 }
 0x1cf   : > { %2139 = vmatpush.xpose.msra.mxu0 %v1807_v1 }
 0x1db   : > { %v1612_v48 = vpop.f32.mrf.mxu1 }
 0x1dc   : > { %v1613_v49 = vadd.f32 %v1612_v48, %v1388_v44 }
 0x1de   : > { %1768 = vst [vmem:[%s3329_s18 + $0x48] sm:$0xff] %v1613_v49  ;;  %2020 = vmatmul.f32.vlgmr.msrb.gmra.mxu2 %v1613_v49 }
 0x1df   : > { %v1592_v54 = vpop.f32.mrf.mxu3 }
 0x1e0   : > { %v1593_v55 = vadd.f32 %v1592_v54, %v1387_v50 }
 0x1e2   : > { %1767 = vst [vmem:[%s3329_s18 + $0x40] sm:$0xff] %v1593_v55  ;;  %2000 = vmatmul.f32.vlgmr.msrb.gmra.mxu1 %v1593_v55 }
 0x1e5   : > { %v1632_v51 = vpop.f32.mrf.mxu2 }
 0x1e6   : > { %v1633_v60 = vadd.f32 %v1632_v51, %v1389_v56 }
 0x1e7   : > { %v1652_v61 = vpop.f32.mrf.mxu3 }
 0x1e8   : > { %1769 = vst [vmem:[%s3329_s18 + $0x50] sm:$0xff] %v1633_v60  ;;  %2040 = vmatmul.f32.vlgmr.msrb.gmra.mxu3 %v1633_v60  ;;  %v1653_v0 = vadd.f32 %v1652_v61, %v1390_v58 }
 0x1ea   : > { %1770 = vst [vmem:[%s3329_s18 + $0x58] sm:$0xff] %v1653_v0  ;;  %2060 = vmatmul.f32.vlgmr.msrb.gmra.mxu0 %v1653_v0 }
 0x1fa   : > { %v1692_v4 = vpop.f32.mrf.mxu1 }
 0x1fb   : > { %v1693_v5 = vadd.f32 %v1692_v4, %v1392_v2  ;;  %v1672_v6 = vpop.f32.mrf.mxu0 }
 0x1fc   : > { %v1673_v7 = vadd.f32 %v1672_v6, %v1391_v3 }
 0x1fd   : > { %1772 = vst [vmem:[%s3329_s18 + $0x68] sm:$0xff] %v1693_v5  ;;  %2100 = vmatmul.f32.vlgmr.msra.gmra.mxu2 %v1693_v5 }
 0x1fe   : > { %1771 = vst [vmem:[%s3329_s18 + $0x60] sm:$0xff] %v1673_v7  ;;  %2080 = vmatmul.f32.vlgmr.msra.gmra.mxu1 %v1673_v7 }
 0x205   : > { %v1712_v10 = vpop.f32.mrf.mxu2 }
 0x206   : > { %v1713_v11 = vadd.f32 %v1712_v10, %v1393_v8  ;;  %v1732_v12 = vpop.f32.mrf.mxu3 }
 0x207   : > { %v1733_v13 = vadd.f32 %v1732_v12, %v1394_v9 }
 0x208   : > { %1773 = vst [vmem:[%s3329_s18 + $0x70] sm:$0xff] %v1713_v11  ;;  %2120 = vmatmul.f32.vlgmr.msra.gmra.mxu3 %v1713_v11 }
 0x209   : > { %1774 = vst [vmem:[%s3329_s18 + $0x78] sm:$0xff] %v1733_v13  ;;  %2140 = vmatmul.f32.vlgmr.msra.gmra.mxu0 %v1733_v13 }
 0x219   : > { %v1756_v22 = vpop.f32.mrf.mxu0  ;;  %v1841_v17 = vpop.f32.mrf.mxu1 }
 0x21a   : > { %v1757_v15 = vadd.f32 %v2679_v14, %v1756_v22 }
 0x21c   : > { %1775 = vst [vmem:[%s656_s17] sm:$0xff] %v1757_v15 }
 0x221   : > { %v1901_v21 = vpop.f32.mrf.mxu0 }
 0x227   : > { %v1861_v16 = vpop.f32.mrf.mxu2 }
 0x228   : > { %v1862_v18 = vadd.f32 %v1861_v16, %v1841_v17 }
 0x22b   : > { %v1881_v19 = vpop.f32.mrf.mxu3 }
 0x22c   : > { %v1882_v20 = vadd.f32 %v1881_v19, %v1862_v18 }
 0x22e   : > { %v1902_v23 = vadd.f32 %v1901_v21, %v1882_v20 }
 0x23f   : > { %v1921_v24 = vpop.f32.mrf.mxu1 }
 0x240   : > { %v1922_v25 = vadd.f32 %v1921_v24, %v1902_v23 }
 0x245   : > { %v1961_v27 = vpop.f32.mrf.mxu3 }
 0x247   : > { %v1941_v26 = vpop.f32.mrf.mxu2  ;;  %v1981_v29 = vpop.f32.mrf.mxu0 }
 0x248   : > { %v1942_v62 = vadd.f32 %v1941_v26, %v1922_v25 }
 0x24a   : > { %v1962_v28 = vadd.f32 %v1961_v27, %v1942_v62 }
 0x24c   : > { %v1982_v30 = vadd.f32 %v1981_v29, %v1962_v28 }
 0x25f   : > { %v2001_v31 = vpop.f32.mrf.mxu1 }
 0x260   : > { %v2002_v32 = vadd.f32 %v2001_v31, %v1982_v30 }
 0x261   : > { %v2021_v33 = vpop.f32.mrf.mxu2 }
 0x262   : > { %v2022_v34 = vadd.f32 %v2021_v33, %v2002_v32 }
 0x267   : > { %v2061_v37 = vpop.f32.mrf.mxu0 }
 0x26b   : > { %v2041_v35 = vpop.f32.mrf.mxu3 }
 0x26c   : > { %v2042_v36 = vadd.f32 %v2041_v35, %v2022_v34 }
 0x26e   : > { %v2062_v38 = vadd.f32 %v2061_v37, %v2042_v36 }
 0x27b   : > { %v2081_v39 = vpop.f32.mrf.mxu1 }
 0x27c   : > { %v2082_v41 = vadd.f32 %v2081_v39, %v2062_v38 }
 0x280   : > { %v2101_v40 = vpop.f32.mrf.mxu2 }
 0x281   : > { %v2102_v42 = vadd.f32 %v2101_v40, %v2082_v41 }
 0x286   : > { %v2141_v44 = vpop.f32.mrf.mxu0 }
 0x28b   : > { %v2121_v43 = vpop.f32.mrf.mxu3 }
 0x28c   : > { %v2122_v45 = vadd.f32 %v2121_v43, %v2102_v42 }
 0x28e   : > { %v2142_v46 = vadd.f32 %v2141_v44, %v2122_v45 }
 0x290   : > { %2145 = vst.msk [vmem:[%s646_s30] sm:$0xff] %vm2144_vm2, %v2142_v46 }
 0x291 PF: > { %p17_p10 = scmp.ge.s32.totalorder %s2909_s13, 4   ;;  %s3408_s30 = smov %s2834_s10 }
 0x292   : > { %s3409_s10 = smov %s2918_s16  ;;  %s3410_s11 = smov %s2909_s13 }
 0x293   :  { %19 = sbr.rel (!%p17_p10) target bundleno = 2 (0x2), region = 216 }

</bundles_post_ra>
